<compile_context>
chip_gen: v6e
topology: v6e:2x2x1
jax: 0.10.0
libtpu: 0.0.40
codegen_flags: <defaults>
</compile_context>

<pallas_src>
import functools

import jax
import jax.numpy as jnp
from jax import lax
from jax.experimental import pallas as pl
from jax.experimental.pallas import tpu as pltpu


def _p6p7_kernel(x_ref, w6_ref, b6_ref, w7_ref, b7_ref, mask6_ref, mask7_ref,
                 p6_ref, p7_ref, pm6_ref, pm7_ref, *, h7, w7):
    """Fused P6 = conv3x3/s2/p1(C5); P7 = conv3x3/s2/p1(relu(P6)).

    x_ref    : (1, 16, h7*w7, Cin)  stride-4 phase split of C5:
               x_ref[0, 4*rh+rw, C*w7+D, c] == C5[4C+rh, 4D+rw, c]
    w6_ref   : (9, Cin, C0) bf16   (tap-major HWIO)     b6_ref: (1, C0) f32
    w7_ref   : (9, C0,  C1) bf16                         b7_ref: (1, C1) f32
    mask6_ref: (4*h7*w7, 1) bf16   0 where (phase b==0 and D==0), else 1
    mask7_ref: (h7*w7,   1) bf16   0 where D==0, else 1
    p6_ref   : (1, 4*h7*w7, C0)    p6, phase-major (row = (2a+b)*h7*w7 + C*w7 + D)
    p7_ref   : (1, h7*w7,   C1)    p7, row-major flattened spatial
    pm6_ref  : VMEM (9, 4*h7*w7, Cin) bf16   per-tap stage-1 operands
    pm7_ref  : VMEM (9, h7*w7,   C0)  bf16   per-tap stage-2 operands
    """
    rows7 = h7 * w7          # p7 spatial positions (= rows per p6 output phase)
    rows6 = 4 * rows7        # p6 spatial positions (4 output phases stacked)
    c0 = p6_ref.shape[-1]
    c1 = p7_ref.shape[-1]

    xv = x_ref[0].astype(jnp.bfloat16)          # (16, rows7, Cin), one cast pass

    # ---------------- stage 1: P6 = conv3x3/s2/p1(C5) -------------------------
    # For p6 output phase (a, b) (ho = 2C+a, wo = 2D+b) and tap (kh, kw) the
    # source is C5[4C + 2a + kh - 1, 4D + 2b + kw - 1], i.e. one stride-4 input
    # phase shifted by (dh, dw) in {0,-1}^2.  In flat (C*w7 + D) row space a
    # 2-D shift is a plain row offset; the only artefact is the D==0 column of
    # kw==0 taps pulling the previous row's last element -> zeroed via mask6.
    pm6_ref[...] = jnp.zeros(pm6_ref.shape, pm6_ref.dtype)
    for kh in range(3):
        for kw in range(3):
            t = 3 * kh + kw
            for a in range(2):
                for b in range(2):
                    op = 2 * a + b
                    qh = 2 * a + kh - 1
                    qw = 2 * b + kw - 1
                    rh, dh = (3, 1) if qh < 0 else (qh, 0)
                    rw, dw = (3, 1) if qw < 0 else (qw, 0)
                    s = dh * w7 + dw
                    pm6_ref[t, op * rows7 + s:(op + 1) * rows7, :] = (
                        xv[4 * rh + rw, 0:rows7 - s, :])

    mask6 = mask6_ref[...]                                    # (rows6, 1) bf16
    acc6 = jnp.broadcast_to(b6_ref[...], (rows6, c0)).astype(jnp.float32)
    for t in range(9):
        operand = pm6_ref[t]                                  # (rows6, Cin) bf16
        if t % 3 == 0:                                        # kw == 0 taps
            operand = operand * mask6
        acc6 = acc6 + jnp.dot(operand, w6_ref[t],
                              preferred_element_type=jnp.float32)
    p6_ref[0] = acc6.astype(p6_ref.dtype)

    # ---------------- stage 2: P7 = conv3x3/s2/p1(relu(P6)) -------------------
    # p6 was produced phase-major, so its stride-2 phases are the contiguous
    # row blocks [op*rows7:(op+1)*rows7] of acc6 -- no strided access needed.
    r = jnp.maximum(acc6, 0.0).astype(jnp.bfloat16)           # (rows6, C0)
    pm7_ref[...] = jnp.zeros(pm7_ref.shape, pm7_ref.dtype)
    for kh in range(3):
        a = (kh + 1) % 2
        dh = 1 if kh == 0 else 0
        for kw in range(3):
            b = (kw + 1) % 2
            dw = 1 if kw == 0 else 0
            t = 3 * kh + kw
            op = 2 * a + b
            s = dh * w7 + dw
            pm7_ref[t, s:rows7, :] = r[op * rows7:op * rows7 + (rows7 - s), :]

    mask7 = mask7_ref[...]                                    # (rows7, 1) bf16
    acc7 = jnp.broadcast_to(b7_ref[...], (rows7, c1)).astype(jnp.float32)
    for t in range(9):
        operand = pm7_ref[t]                                  # (rows7, C0) bf16
        if t % 3 == 0:                                        # kw == 0 taps
            operand = operand * mask7
        acc7 = acc7 + jnp.dot(operand, w7_ref[t],
                              preferred_element_type=jnp.float32)
    p7_ref[0] = acc7.astype(p7_ref.dtype)


def last_level_p6p7(c5_nchw, w6_hwio, b6, w7_hwio, b7):
    """JAX wrapper: NCHW in, (p6, p7) NCHW out; single fused Pallas call."""
    n, c_in, H, W = c5_nchw.shape
    assert H % 4 == 0 and W % 4 == 0, "H, W must be divisible by 4"
    h6, w6 = H // 2, W // 2
    h7, w7 = H // 4, W // 4
    rows7 = h7 * w7
    rows6 = 4 * rows7
    c0 = w6_hwio.shape[-1]
    c1 = w7_hwio.shape[-1]

    # Single fused layout pass (the NCHW->channels-last move we need anyway):
    # xp[n, 4*rh+rw, C*w7+D, c] == c5[n, c, 4C+rh, 4D+rw].  No pad / phase
    # stack is materialized separately.
    xp = c5_nchw.reshape(n, c_in, h7, 4, w7, 4).transpose(0, 3, 5, 2, 4, 1)
    xp = xp.reshape(n, 16, rows7, c_in)

    # One-time host-side weight prep: tap-major, bf16 for the MXU.
    w6k = w6_hwio.reshape(9, c_in, c0).astype(jnp.bfloat16)
    w7k = w7_hwio.reshape(9, c0, c1).astype(jnp.bfloat16)
    b6k = b6.reshape(1, c0).astype(jnp.float32)
    b7k = b7.reshape(1, c1).astype(jnp.float32)

    # 0/1 masks for the flat-shift boundary (kw==0 taps, left zero padding).
    row6 = jnp.arange(rows6)
    m6 = jnp.where((((row6 // rows7) % 2) == 0) & ((row6 % w7) == 0), 0.0, 1.0)
    m6 = m6.astype(jnp.bfloat16).reshape(rows6, 1)
    row7 = jnp.arange(rows7)
    m7 = jnp.where((row7 % w7) == 0, 0.0, 1.0).astype(jnp.bfloat16).reshape(rows7, 1)

    kernel = functools.partial(_p6p7_kernel, h7=h7, w7=w7)
    p6_flat, p7_flat = pl.pallas_call(
        kernel,
        grid=(n,),
        in_specs=[
            pl.BlockSpec((1, 16, rows7, c_in), lambda i: (i, 0, 0, 0)),
            pl.BlockSpec((9, c_in, c0), lambda i: (0, 0, 0)),
            pl.BlockSpec((1, c0), lambda i: (0, 0)),
            pl.BlockSpec((9, c0, c1), lambda i: (0, 0, 0)),
            pl.BlockSpec((1, c1), lambda i: (0, 0)),
            pl.BlockSpec((rows6, 1), lambda i: (0, 0)),
            pl.BlockSpec((rows7, 1), lambda i: (0, 0)),
        ],
        out_specs=(
            pl.BlockSpec((1, rows6, c0), lambda i: (i, 0, 0)),
            pl.BlockSpec((1, rows7, c1), lambda i: (i, 0, 0)),
        ),
        out_shape=(
            jax.ShapeDtypeStruct((n, rows6, c0), jnp.float32),
            jax.ShapeDtypeStruct((n, rows7, c1), jnp.float32),
        ),
        scratch_shapes=[
            pltpu.VMEM((9, rows6, c_in), jnp.bfloat16),
            pltpu.VMEM((9, rows7, c0), jnp.bfloat16),
        ],
        compiler_params=pltpu.CompilerParams(
            dimension_semantics=("parallel",),
            vmem_limit_bytes=32 * 1024 * 1024,
        ),
    )(xp, w6k, b6k, w7k, b7k, m6, m7)

    # Recombine phase-major p6 / flat p7 back to NCHW.  Each is one fused XLA
    # transpose pass -- the same pass a plain NHWC->NCHW move would need.
    p6 = p6_flat.reshape(n, 2, 2, h7, w7, c0).transpose(0, 5, 3, 1, 4, 2)
    p6 = p6.reshape(n, c0, h6, w6)
    p7 = p7_flat.reshape(n, h7, w7, c1).transpose(0, 3, 1, 2)
    return p6, p7


class LastLevelP6P7:
    """JAX/Pallas port of the PyTorch LastLevelP6P7 module (forward only)."""

    num_levels = 2

    def __init__(self, input_channels, output_channels, key):
        if isinstance(output_channels, int):
            output_channels = [output_channels] * self.num_levels
        assert len(output_channels) == self.num_levels
        c0, c1 = output_channels
        k6w, k6b, k7w, k7b = jax.random.split(key, 4)
        # Deterministic synthetic init; HWIO layout, same parameter shapes as
        # nn.Conv2d(in, out, 3, 2, 1).
        self.w6 = jax.random.normal(k6w, (3, 3, input_channels, c0), jnp.float32) * 0.1
        self.b6 = jax.random.normal(k6b, (c0,), jnp.float32) * 0.1
        self.w7 = jax.random.normal(k7w, (3, 3, c0, c1), jnp.float32) * 0.1
        self.b7 = jax.random.normal(k7b, (c1,), jnp.float32) * 0.1
        self._fwd = jax.jit(last_level_p6p7)

    def __call__(self, c5_nchw):
        return self._fwd(c5_nchw, self.w6, self.b6, self.w7, self.b7)


if __name__ == "__main__":
    key = jax.random.PRNGKey(0)
    kx, kp = jax.random.split(key)

    n, c_in, h, w = 2, 4, 16, 16
    c_out = 8
    c5 = jax.random.normal(kx, (n, c_in, h, w), jnp.float32)    # NCHW, PyTorch-like

    mod = LastLevelP6P7(c_in, c_out, kp)
    p6, p7 = mod(c5)
    p6 = jax.block_until_ready(p6)
    p7 = jax.block_until_ready(p7)

    # Pure-JAX references (same semantics as the PyTorch module).
    def ref_conv(x_nhwc, w_hwio, b):
        y = lax.conv_general_dilated(x_nhwc, w_hwio, (2, 2), ((1, 1), (1, 1)),
                                     dimension_numbers=("NHWC", "HWIO", "NHWC"))
        return y + b

    x_nhwc = jnp.transpose(c5, (0, 2, 3, 1))
    to_nchw = lambda a: jnp.transpose(a, (0, 3, 1, 2))
    bf = lambda a: a.astype(jnp.bfloat16).astype(jnp.float32)

    # (a) exact f32 reference == PyTorch module math; the kernel feeds bf16
    #     operands to the MXU (f32 accumulation), so compare loosely.
    p6_f32 = ref_conv(x_nhwc, mod.w6, mod.b6)
    p7_f32 = ref_conv(jax.nn.relu(p6_f32), mod.w7, mod.b7)
    # (b) bf16-rounded-operand reference: same rounding as the kernel's MXU
    #     inputs with f32 accumulation -> tight tolerance.
    p6_bf = ref_conv(bf(x_nhwc), bf(mod.w6), mod.b6)
    p7_bf = ref_conv(bf(jax.nn.relu(p6_bf)), bf(mod.w7), mod.b7)

    assert p6.shape == (n, c_out, h // 2, w // 2)
    assert p7.shape == (n, c_out, h // 4, w // 4)
    assert jnp.allclose(p6, to_nchw(p6_bf), atol=5e-3, rtol=5e-3)
    assert jnp.allclose(p7, to_nchw(p7_bf), atol=5e-3, rtol=5e-3)
    assert jnp.allclose(p6, to_nchw(p6_f32), atol=5e-2, rtol=5e-2)
    assert jnp.allclose(p7, to_nchw(p7_f32), atol=5e-2, rtol=5e-2)

    print("KERNEL_OK")
</pallas_src>

<mosaic_0001>
module attributes {stable_mosaic.version = 11 : i64} {
  func.func @_p6p7_kernel(%arg0: i32, %arg1: memref<1x16x16x4xf32, #tpu.memory_space<vmem>>, %arg2: memref<9x4x8xbf16, #tpu.memory_space<vmem>>, %arg3: memref<1x8xf32, #tpu.memory_space<vmem>>, %arg4: memref<9x8x8xbf16, #tpu.memory_space<vmem>>, %arg5: memref<1x8xf32, #tpu.memory_space<vmem>>, %arg6: memref<64x1xbf16, #tpu.memory_space<vmem>>, %arg7: memref<16x1xbf16, #tpu.memory_space<vmem>>, %arg8: memref<1x64x8xf32, #tpu.memory_space<vmem>>, %arg9: memref<1x16x8xf32, #tpu.memory_space<vmem>>, %arg10: memref<9x64x4xbf16, #tpu.memory_space<vmem>>, %arg11: memref<9x16x8xbf16, #tpu.memory_space<vmem>>) attributes {dimension_semantics = [#tpu.dimension_semantics<parallel>], iteration_bounds = array<i64: 2>, scalar_prefetch = 0 : i64, scratch_operands = 2 : i64, tpu.core_type = #tpu.core_type<tc>, window_params = [{transform_indices = @transform_0, window_bounds = array<i64: 1, 16, 16, 4>}, {pipeline_mode = #tpu.pipeline_mode<synchronous>, transform_indices = @transform_1, window_bounds = array<i64: 9, 4, 8>}, {pipeline_mode = #tpu.pipeline_mode<synchronous>, transform_indices = @transform_2, window_bounds = array<i64: 1, 8>}, {pipeline_mode = #tpu.pipeline_mode<synchronous>, transform_indices = @transform_3, window_bounds = array<i64: 9, 8, 8>}, {pipeline_mode = #tpu.pipeline_mode<synchronous>, transform_indices = @transform_4, window_bounds = array<i64: 1, 8>}, {pipeline_mode = #tpu.pipeline_mode<synchronous>, transform_indices = @transform_5, window_bounds = array<i64: 64, 1>}, {pipeline_mode = #tpu.pipeline_mode<synchronous>, transform_indices = @transform_6, window_bounds = array<i64: 16, 1>}, {transform_indices = @transform_7, window_bounds = array<i64: 1, 64, 8>}, {transform_indices = @transform_8, window_bounds = array<i64: 1, 16, 8>}]} {
    %c0 = arith.constant 0 : index
    %c0_0 = arith.constant 0 : index
    %c0_1 = arith.constant 0 : index
    %c0_2 = arith.constant 0 : index
    %0 = vector.load %arg1[%c0, %c0_0, %c0_1, %c0_2] : memref<1x16x16x4xf32, #tpu.memory_space<vmem>>, vector<1x16x16x4xf32>
    %1 = vector.shape_cast %0 : vector<1x16x16x4xf32> to vector<16x16x4xf32>
    %2 = arith.truncf %1 : vector<16x16x4xf32> to vector<16x16x4xbf16>
    %cst = arith.constant 0.000000e+00 : bf16
    %3 = vector.broadcast %cst : bf16 to vector<9x64x4xbf16>
    %c0_3 = arith.constant 0 : index
    %c0_4 = arith.constant 0 : index
    %c0_5 = arith.constant 0 : index
    %4 = vector.load %arg10[%c0_3, %c0_4, %c0_5] : memref<9x64x4xbf16, #tpu.memory_space<vmem>>, vector<9x64x4xbf16>
    tpu.vector_store %arg10[%c0_3, %c0_4, %c0_5], %3 {strides = array<i32>} : memref<9x64x4xbf16, #tpu.memory_space<vmem>>, vector<9x64x4xbf16>,
    %5 = vector.extract_strided_slice %2 {offsets = [15, 0, 0], sizes = [1, 11, 4], strides = [1, 1, 1]} : vector<16x16x4xbf16> to vector<1x11x4xbf16>
    %6 = vector.shape_cast %5 : vector<1x11x4xbf16> to vector<11x4xbf16>
    %c0_6 = arith.constant 0 : index
    %c5 = arith.constant 5 : index
    %c0_7 = arith.constant 0 : index
    %7 = vector.load %arg10[%c0_6, %c5, %c0_7] : memref<9x64x4xbf16, #tpu.memory_space<vmem>>, vector<1x11x4xbf16>
    %8 = vector.shape_cast %7 : vector<1x11x4xbf16> to vector<11x4xbf16>
    %9 = vector.shape_cast %6 : vector<11x4xbf16> to vector<1x11x4xbf16>
    tpu.vector_store %arg10[%c0_6, %c5, %c0_7], %9 {strides = array<i32>} : memref<9x64x4xbf16, #tpu.memory_space<vmem>>, vector<1x11x4xbf16>,
    %10 = vector.extract_strided_slice %2 {offsets = [13, 0, 0], sizes = [1, 12, 4], strides = [1, 1, 1]} : vector<16x16x4xbf16> to vector<1x12x4xbf16>
    %11 = vector.shape_cast %10 : vector<1x12x4xbf16> to vector<12x4xbf16>
    %c0_8 = arith.constant 0 : index
    %c20 = arith.constant 20 : index
    %c0_9 = arith.constant 0 : index
    %12 = vector.load %arg10[%c0_8, %c20, %c0_9] : memref<9x64x4xbf16, #tpu.memory_space<vmem>>, vector<1x12x4xbf16>
    %13 = vector.shape_cast %12 : vector<1x12x4xbf16> to vector<12x4xbf16>
    %14 = vector.shape_cast %11 : vector<12x4xbf16> to vector<1x12x4xbf16>
    tpu.vector_store %arg10[%c0_8, %c20, %c0_9], %14 {strides = array<i32>} : memref<9x64x4xbf16, #tpu.memory_space<vmem>>, vector<1x12x4xbf16>,
    %15 = vector.extract_strided_slice %2 {offsets = [7, 0, 0], sizes = [1, 15, 4], strides = [1, 1, 1]} : vector<16x16x4xbf16> to vector<1x15x4xbf16>
    %16 = vector.shape_cast %15 : vector<1x15x4xbf16> to vector<15x4xbf16>
    %c0_10 = arith.constant 0 : index
    %c33 = arith.constant 33 : index
    %c0_11 = arith.constant 0 : index
    %17 = vector.load %arg10[%c0_10, %c33, %c0_11] : memref<9x64x4xbf16, #tpu.memory_space<vmem>>, vector<1x15x4xbf16>
    %18 = vector.shape_cast %17 : vector<1x15x4xbf16> to vector<15x4xbf16>
    %19 = vector.shape_cast %16 : vector<15x4xbf16> to vector<1x15x4xbf16>
    tpu.vector_store %arg10[%c0_10, %c33, %c0_11], %19 {strides = array<i32>} : memref<9x64x4xbf16, #tpu.memory_space<vmem>>, vector<1x15x4xbf16>,
    %20 = vector.extract_strided_slice %2 {offsets = [5, 0, 0], sizes = [1, 16, 4], strides = [1, 1, 1]} : vector<16x16x4xbf16> to vector<1x16x4xbf16>
    %21 = vector.shape_cast %20 : vector<1x16x4xbf16> to vector<16x4xbf16>
    %c0_12 = arith.constant 0 : index
    %c48 = arith.constant 48 : index
    %c0_13 = arith.constant 0 : index
    %22 = vector.load %arg10[%c0_12, %c48, %c0_13] : memref<9x64x4xbf16, #tpu.memory_space<vmem>>, vector<1x16x4xbf16>
    %23 = vector.shape_cast %22 : vector<1x16x4xbf16> to vector<16x4xbf16>
    %24 = vector.shape_cast %21 : vector<16x4xbf16> to vector<1x16x4xbf16>
    tpu.vector_store %arg10[%c0_12, %c48, %c0_13], %24 {strides = array<i32>} : memref<9x64x4xbf16, #tpu.memory_space<vmem>>, vector<1x16x4xbf16>,
    %25 = vector.extract_strided_slice %2 {offsets = [12, 0, 0], sizes = [1, 12, 4], strides = [1, 1, 1]} : vector<16x16x4xbf16> to vector<1x12x4xbf16>
    %26 = vector.shape_cast %25 : vector<1x12x4xbf16> to vector<12x4xbf16>
    %c1 = arith.constant 1 : index
    %c4 = arith.constant 4 : index
    %c0_14 = arith.constant 0 : index
    %27 = vector.load %arg10[%c1, %c4, %c0_14] : memref<9x64x4xbf16, #tpu.memory_space<vmem>>, vector<1x12x4xbf16>
    %28 = vector.shape_cast %27 : vector<1x12x4xbf16> to vector<12x4xbf16>
    %29 = vector.shape_cast %26 : vector<12x4xbf16> to vector<1x12x4xbf16>
    tpu.vector_store %arg10[%c1, %c4, %c0_14], %29 {strides = array<i32>} : memref<9x64x4xbf16, #tpu.memory_space<vmem>>, vector<1x12x4xbf16>,
    %30 = vector.extract_strided_slice %2 {offsets = [14, 0, 0], sizes = [1, 12, 4], strides = [1, 1, 1]} : vector<16x16x4xbf16> to vector<1x12x4xbf16>
    %31 = vector.shape_cast %30 : vector<1x12x4xbf16> to vector<12x4xbf16>
    %c1_15 = arith.constant 1 : index
    %c20_16 = arith.constant 20 : index
    %c0_17 = arith.constant 0 : index
    %32 = vector.load %arg10[%c1_15, %c20_16, %c0_17] : memref<9x64x4xbf16, #tpu.memory_space<vmem>>, vector<1x12x4xbf16>
    %33 = vector.shape_cast %32 : vector<1x12x4xbf16> to vector<12x4xbf16>
    %34 = vector.shape_cast %31 : vector<12x4xbf16> to vector<1x12x4xbf16>
    tpu.vector_store %arg10[%c1_15, %c20_16, %c0_17], %34 {strides = array<i32>} : memref<9x64x4xbf16, #tpu.memory_space<vmem>>, vector<1x12x4xbf16>,
    %35 = vector.extract_strided_slice %2 {offsets = [4, 0, 0], sizes = [1, 16, 4], strides = [1, 1, 1]} : vector<16x16x4xbf16> to vector<1x16x4xbf16>
    %36 = vector.shape_cast %35 : vector<1x16x4xbf16> to vector<16x4xbf16>
    %c1_18 = arith.constant 1 : index
    %c32 = arith.constant 32 : index
    %c0_19 = arith.constant 0 : index
    %37 = vector.load %arg10[%c1_18, %c32, %c0_19] : memref<9x64x4xbf16, #tpu.memory_space<vmem>>, vector<1x16x4xbf16>
    %38 = vector.shape_cast %37 : vector<1x16x4xbf16> to vector<16x4xbf16>
    %39 = vector.shape_cast %36 : vector<16x4xbf16> to vector<1x16x4xbf16>
    tpu.vector_store %arg10[%c1_18, %c32, %c0_19], %39 {strides = array<i32>} : memref<9x64x4xbf16, #tpu.memory_space<vmem>>, vector<1x16x4xbf16>,
    %40 = vector.extract_strided_slice %2 {offsets = [6, 0, 0], sizes = [1, 16, 4], strides = [1, 1, 1]} : vector<16x16x4xbf16> to vector<1x16x4xbf16>
    %41 = vector.shape_cast %40 : vector<1x16x4xbf16> to vector<16x4xbf16>
    %c1_20 = arith.constant 1 : index
    %c48_21 = arith.constant 48 : index
    %c0_22 = arith.constant 0 : index
    %42 = vector.load %arg10[%c1_20, %c48_21, %c0_22] : memref<9x64x4xbf16, #tpu.memory_space<vmem>>, vector<1x16x4xbf16>
    %43 = vector.shape_cast %42 : vector<1x16x4xbf16> to vector<16x4xbf16>
    %44 = vector.shape_cast %41 : vector<16x4xbf16> to vector<1x16x4xbf16>
    tpu.vector_store %arg10[%c1_20, %c48_21, %c0_22], %44 {strides = array<i32>} : memref<9x64x4xbf16, #tpu.memory_space<vmem>>, vector<1x16x4xbf16>,
    %45 = vector.extract_strided_slice %2 {offsets = [13, 0, 0], sizes = [1, 12, 4], strides = [1, 1, 1]} : vector<16x16x4xbf16> to vector<1x12x4xbf16>
    %46 = vector.shape_cast %45 : vector<1x12x4xbf16> to vector<12x4xbf16>
    %c2 = arith.constant 2 : index
    %c4_23 = arith.constant 4 : index
    %c0_24 = arith.constant 0 : index
    %47 = vector.load %arg10[%c2, %c4_23, %c0_24] : memref<9x64x4xbf16, #tpu.memory_space<vmem>>, vector<1x12x4xbf16>
    %48 = vector.shape_cast %47 : vector<1x12x4xbf16> to vector<12x4xbf16>
    %49 = vector.shape_cast %46 : vector<12x4xbf16> to vector<1x12x4xbf16>
    tpu.vector_store %arg10[%c2, %c4_23, %c0_24], %49 {strides = array<i32>} : memref<9x64x4xbf16, #tpu.memory_space<vmem>>, vector<1x12x4xbf16>,
    %50 = vector.extract_strided_slice %2 {offsets = [15, 0, 0], sizes = [1, 12, 4], strides = [1, 1, 1]} : vector<16x16x4xbf16> to vector<1x12x4xbf16>
    %51 = vector.shape_cast %50 : vector<1x12x4xbf16> to vector<12x4xbf16>
    %c2_25 = arith.constant 2 : index
    %c20_26 = arith.constant 20 : index
    %c0_27 = arith.constant 0 : index
    %52 = vector.load %arg10[%c2_25, %c20_26, %c0_27] : memref<9x64x4xbf16, #tpu.memory_space<vmem>>, vector<1x12x4xbf16>
    %53 = vector.shape_cast %52 : vector<1x12x4xbf16> to vector<12x4xbf16>
    %54 = vector.shape_cast %51 : vector<12x4xbf16> to vector<1x12x4xbf16>
    tpu.vector_store %arg10[%c2_25, %c20_26, %c0_27], %54 {strides = array<i32>} : memref<9x64x4xbf16, #tpu.memory_space<vmem>>, vector<1x12x4xbf16>,
    %55 = vector.extract_strided_slice %2 {offsets = [5, 0, 0], sizes = [1, 16, 4], strides = [1, 1, 1]} : vector<16x16x4xbf16> to vector<1x16x4xbf16>
    %56 = vector.shape_cast %55 : vector<1x16x4xbf16> to vector<16x4xbf16>
    %c2_28 = arith.constant 2 : index
    %c32_29 = arith.constant 32 : index
    %c0_30 = arith.constant 0 : index
    %57 = vector.load %arg10[%c2_28, %c32_29, %c0_30] : memref<9x64x4xbf16, #tpu.memory_space<vmem>>, vector<1x16x4xbf16>
    %58 = vector.shape_cast %57 : vector<1x16x4xbf16> to vector<16x4xbf16>
    %59 = vector.shape_cast %56 : vector<16x4xbf16> to vector<1x16x4xbf16>
    tpu.vector_store %arg10[%c2_28, %c32_29, %c0_30], %59 {strides = array<i32>} : memref<9x64x4xbf16, #tpu.memory_space<vmem>>, vector<1x16x4xbf16>,
    %60 = vector.extract_strided_slice %2 {offsets = [7, 0, 0], sizes = [1, 16, 4], strides = [1, 1, 1]} : vector<16x16x4xbf16> to vector<1x16x4xbf16>
    %61 = vector.shape_cast %60 : vector<1x16x4xbf16> to vector<16x4xbf16>
    %c2_31 = arith.constant 2 : index
    %c48_32 = arith.constant 48 : index
    %c0_33 = arith.constant 0 : index
    %62 = vector.load %arg10[%c2_31, %c48_32, %c0_33] : memref<9x64x4xbf16, #tpu.memory_space<vmem>>, vector<1x16x4xbf16>
    %63 = vector.shape_cast %62 : vector<1x16x4xbf16> to vector<16x4xbf16>
    %64 = vector.shape_cast %61 : vector<16x4xbf16> to vector<1x16x4xbf16>
    tpu.vector_store %arg10[%c2_31, %c48_32, %c0_33], %64 {strides = array<i32>} : memref<9x64x4xbf16, #tpu.memory_space<vmem>>, vector<1x16x4xbf16>,
    %65 = vector.extract_strided_slice %2 {offsets = [3, 0, 0], sizes = [1, 15, 4], strides = [1, 1, 1]} : vector<16x16x4xbf16> to vector<1x15x4xbf16>
    %66 = vector.shape_cast %65 : vector<1x15x4xbf16> to vector<15x4xbf16>
    %c3 = arith.constant 3 : index
    %c1_34 = arith.constant 1 : index
    %c0_35 = arith.constant 0 : index
    %67 = vector.load %arg10[%c3, %c1_34, %c0_35] : memref<9x64x4xbf16, #tpu.memory_space<vmem>>, vector<1x15x4xbf16>
    %68 = vector.shape_cast %67 : vector<1x15x4xbf16> to vector<15x4xbf16>
    %69 = vector.shape_cast %66 : vector<15x4xbf16> to vector<1x15x4xbf16>
    tpu.vector_store %arg10[%c3, %c1_34, %c0_35], %69 {strides = array<i32>} : memref<9x64x4xbf16, #tpu.memory_space<vmem>>, vector<1x15x4xbf16>,
    %70 = vector.extract_strided_slice %2 {offsets = [1, 0, 0], sizes = [1, 16, 4], strides = [1, 1, 1]} : vector<16x16x4xbf16> to vector<1x16x4xbf16>
    %71 = vector.shape_cast %70 : vector<1x16x4xbf16> to vector<16x4xbf16>
    %c3_36 = arith.constant 3 : index
    %c16 = arith.constant 16 : index
    %c0_37 = arith.constant 0 : index
    %72 = vector.load %arg10[%c3_36, %c16, %c0_37] : memref<9x64x4xbf16, #tpu.memory_space<vmem>>, vector<1x16x4xbf16>
    %73 = vector.shape_cast %72 : vector<1x16x4xbf16> to vector<16x4xbf16>
    %74 = vector.shape_cast %71 : vector<16x4xbf16> to vector<1x16x4xbf16>
    tpu.vector_store %arg10[%c3_36, %c16, %c0_37], %74 {strides = array<i32>} : memref<9x64x4xbf16, #tpu.memory_space<vmem>>, vector<1x16x4xbf16>,
    %75 = vector.extract_strided_slice %2 {offsets = [11, 0, 0], sizes = [1, 15, 4], strides = [1, 1, 1]} : vector<16x16x4xbf16> to vector<1x15x4xbf16>
    %76 = vector.shape_cast %75 : vector<1x15x4xbf16> to vector<15x4xbf16>
    %c3_38 = arith.constant 3 : index
    %c33_39 = arith.constant 33 : index
    %c0_40 = arith.constant 0 : index
    %77 = vector.load %arg10[%c3_38, %c33_39, %c0_40] : memref<9x64x4xbf16, #tpu.memory_space<vmem>>, vector<1x15x4xbf16>
    %78 = vector.shape_cast %77 : vector<1x15x4xbf16> to vector<15x4xbf16>
    %79 = vector.shape_cast %76 : vector<15x4xbf16> to vector<1x15x4xbf16>
    tpu.vector_store %arg10[%c3_38, %c33_39, %c0_40], %79 {strides = array<i32>} : memref<9x64x4xbf16, #tpu.memory_space<vmem>>, vector<1x15x4xbf16>,
    %80 = vector.extract_strided_slice %2 {offsets = [9, 0, 0], sizes = [1, 16, 4], strides = [1, 1, 1]} : vector<16x16x4xbf16> to vector<1x16x4xbf16>
    %81 = vector.shape_cast %80 : vector<1x16x4xbf16> to vector<16x4xbf16>
    %c3_41 = arith.constant 3 : index
    %c48_42 = arith.constant 48 : index
    %c0_43 = arith.constant 0 : index
    %82 = vector.load %arg10[%c3_41, %c48_42, %c0_43] : memref<9x64x4xbf16, #tpu.memory_space<vmem>>, vector<1x16x4xbf16>
    %83 = vector.shape_cast %82 : vector<1x16x4xbf16> to vector<16x4xbf16>
    %84 = vector.shape_cast %81 : vector<16x4xbf16> to vector<1x16x4xbf16>
    tpu.vector_store %arg10[%c3_41, %c48_42, %c0_43], %84 {strides = array<i32>} : memref<9x64x4xbf16, #tpu.memory_space<vmem>>, vector<1x16x4xbf16>,
    %85 = vector.extract_strided_slice %2 {offsets = [0, 0, 0], sizes = [1, 16, 4], strides = [1, 1, 1]} : vector<16x16x4xbf16> to vector<1x16x4xbf16>
    %86 = vector.shape_cast %85 : vector<1x16x4xbf16> to vector<16x4xbf16>
    %c4_44 = arith.constant 4 : index
    %c0_45 = arith.constant 0 : index
    %c0_46 = arith.constant 0 : index
    %87 = vector.load %arg10[%c4_44, %c0_45, %c0_46] : memref<9x64x4xbf16, #tpu.memory_space<vmem>>, vector<1x16x4xbf16>
    %88 = vector.shape_cast %87 : vector<1x16x4xbf16> to vector<16x4xbf16>
    %89 = vector.shape_cast %86 : vector<16x4xbf16> to vector<1x16x4xbf16>
    tpu.vector_store %arg10[%c4_44, %c0_45, %c0_46], %89 {strides = array<i32>} : memref<9x64x4xbf16, #tpu.memory_space<vmem>>, vector<1x16x4xbf16>,
    %90 = vector.extract_strided_slice %2 {offsets = [2, 0, 0], sizes = [1, 16, 4], strides = [1, 1, 1]} : vector<16x16x4xbf16> to vector<1x16x4xbf16>
    %91 = vector.shape_cast %90 : vector<1x16x4xbf16> to vector<16x4xbf16>
    %c4_47 = arith.constant 4 : index
    %c16_48 = arith.constant 16 : index
    %c0_49 = arith.constant 0 : index
    %92 = vector.load %arg10[%c4_47, %c16_48, %c0_49] : memref<9x64x4xbf16, #tpu.memory_space<vmem>>, vector<1x16x4xbf16>
    %93 = vector.shape_cast %92 : vector<1x16x4xbf16> to vector<16x4xbf16>
    %94 = vector.shape_cast %91 : vector<16x4xbf16> to vector<1x16x4xbf16>
    tpu.vector_store %arg10[%c4_47, %c16_48, %c0_49], %94 {strides = array<i32>} : memref<9x64x4xbf16, #tpu.memory_space<vmem>>, vector<1x16x4xbf16>,
    %95 = vector.extract_strided_slice %2 {offsets = [8, 0, 0], sizes = [1, 16, 4], strides = [1, 1, 1]} : vector<16x16x4xbf16> to vector<1x16x4xbf16>
    %96 = vector.shape_cast %95 : vector<1x16x4xbf16> to vector<16x4xbf16>
    %c4_50 = arith.constant 4 : index
    %c32_51 = arith.constant 32 : index
    %c0_52 = arith.constant 0 : index
    %97 = vector.load %arg10[%c4_50, %c32_51, %c0_52] : memref<9x64x4xbf16, #tpu.memory_space<vmem>>, vector<1x16x4xbf16>
    %98 = vector.shape_cast %97 : vector<1x16x4xbf16> to vector<16x4xbf16>
    %99 = vector.shape_cast %96 : vector<16x4xbf16> to vector<1x16x4xbf16>
    tpu.vector_store %arg10[%c4_50, %c32_51, %c0_52], %99 {strides = array<i32>} : memref<9x64x4xbf16, #tpu.memory_space<vmem>>, vector<1x16x4xbf16>,
    %100 = vector.extract_strided_slice %2 {offsets = [10, 0, 0], sizes = [1, 16, 4], strides = [1, 1, 1]} : vector<16x16x4xbf16> to vector<1x16x4xbf16>
    %101 = vector.shape_cast %100 : vector<1x16x4xbf16> to vector<16x4xbf16>
    %c4_53 = arith.constant 4 : index
    %c48_54 = arith.constant 48 : index
    %c0_55 = arith.constant 0 : index
    %102 = vector.load %arg10[%c4_53, %c48_54, %c0_55] : memref<9x64x4xbf16, #tpu.memory_space<vmem>>, vector<1x16x4xbf16>
    %103 = vector.shape_cast %102 : vector<1x16x4xbf16> to vector<16x4xbf16>
    %104 = vector.shape_cast %101 : vector<16x4xbf16> to vector<1x16x4xbf16>
    tpu.vector_store %arg10[%c4_53, %c48_54, %c0_55], %104 {strides = array<i32>} : memref<9x64x4xbf16, #tpu.memory_space<vmem>>, vector<1x16x4xbf16>,
    %105 = vector.extract_strided_slice %2 {offsets = [1, 0, 0], sizes = [1, 16, 4], strides = [1, 1, 1]} : vector<16x16x4xbf16> to vector<1x16x4xbf16>
    %106 = vector.shape_cast %105 : vector<1x16x4xbf16> to vector<16x4xbf16>
    %c5_56 = arith.constant 5 : index
    %c0_57 = arith.constant 0 : index
    %c0_58 = arith.constant 0 : index
    %107 = vector.load %arg10[%c5_56, %c0_57, %c0_58] : memref<9x64x4xbf16, #tpu.memory_space<vmem>>, vector<1x16x4xbf16>
    %108 = vector.shape_cast %107 : vector<1x16x4xbf16> to vector<16x4xbf16>
    %109 = vector.shape_cast %106 : vector<16x4xbf16> to vector<1x16x4xbf16>
    tpu.vector_store %arg10[%c5_56, %c0_57, %c0_58], %109 {strides = array<i32>} : memref<9x64x4xbf16, #tpu.memory_space<vmem>>, vector<1x16x4xbf16>,
    %110 = vector.extract_strided_slice %2 {offsets = [3, 0, 0], sizes = [1, 16, 4], strides = [1, 1, 1]} : vector<16x16x4xbf16> to vector<1x16x4xbf16>
    %111 = vector.shape_cast %110 : vector<1x16x4xbf16> to vector<16x4xbf16>
    %c5_59 = arith.constant 5 : index
    %c16_60 = arith.constant 16 : index
    %c0_61 = arith.constant 0 : index
    %112 = vector.load %arg10[%c5_59, %c16_60, %c0_61] : memref<9x64x4xbf16, #tpu.memory_space<vmem>>, vector<1x16x4xbf16>
    %113 = vector.shape_cast %112 : vector<1x16x4xbf16> to vector<16x4xbf16>
    %114 = vector.shape_cast %111 : vector<16x4xbf16> to vector<1x16x4xbf16>
    tpu.vector_store %arg10[%c5_59, %c16_60, %c0_61], %114 {strides = array<i32>} : memref<9x64x4xbf16, #tpu.memory_space<vmem>>, vector<1x16x4xbf16>,
    %115 = vector.extract_strided_slice %2 {offsets = [9, 0, 0], sizes = [1, 16, 4], strides = [1, 1, 1]} : vector<16x16x4xbf16> to vector<1x16x4xbf16>
    %116 = vector.shape_cast %115 : vector<1x16x4xbf16> to vector<16x4xbf16>
    %c5_62 = arith.constant 5 : index
    %c32_63 = arith.constant 32 : index
    %c0_64 = arith.constant 0 : index
    %117 = vector.load %arg10[%c5_62, %c32_63, %c0_64] : memref<9x64x4xbf16, #tpu.memory_space<vmem>>, vector<1x16x4xbf16>
    %118 = vector.shape_cast %117 : vector<1x16x4xbf16> to vector<16x4xbf16>
    %119 = vector.shape_cast %116 : vector<16x4xbf16> to vector<1x16x4xbf16>
    tpu.vector_store %arg10[%c5_62, %c32_63, %c0_64], %119 {strides = array<i32>} : memref<9x64x4xbf16, #tpu.memory_space<vmem>>, vector<1x16x4xbf16>,
    %120 = vector.extract_strided_slice %2 {offsets = [11, 0, 0], sizes = [1, 16, 4], strides = [1, 1, 1]} : vector<16x16x4xbf16> to vector<1x16x4xbf16>
    %121 = vector.shape_cast %120 : vector<1x16x4xbf16> to vector<16x4xbf16>
    %c5_65 = arith.constant 5 : index
    %c48_66 = arith.constant 48 : index
    %c0_67 = arith.constant 0 : index
    %122 = vector.load %arg10[%c5_65, %c48_66, %c0_67] : memref<9x64x4xbf16, #tpu.memory_space<vmem>>, vector<1x16x4xbf16>
    %123 = vector.shape_cast %122 : vector<1x16x4xbf16> to vector<16x4xbf16>
    %124 = vector.shape_cast %121 : vector<16x4xbf16> to vector<1x16x4xbf16>
    tpu.vector_store %arg10[%c5_65, %c48_66, %c0_67], %124 {strides = array<i32>} : memref<9x64x4xbf16, #tpu.memory_space<vmem>>, vector<1x16x4xbf16>,
    %125 = vector.extract_strided_slice %2 {offsets = [7, 0, 0], sizes = [1, 15, 4], strides = [1, 1, 1]} : vector<16x16x4xbf16> to vector<1x15x4xbf16>
    %126 = vector.shape_cast %125 : vector<1x15x4xbf16> to vector<15x4xbf16>
    %c6 = arith.constant 6 : index
    %c1_68 = arith.constant 1 : index
    %c0_69 = arith.constant 0 : index
    %127 = vector.load %arg10[%c6, %c1_68, %c0_69] : memref<9x64x4xbf16, #tpu.memory_space<vmem>>, vector<1x15x4xbf16>
    %128 = vector.shape_cast %127 : vector<1x15x4xbf16> to vector<15x4xbf16>
    %129 = vector.shape_cast %126 : vector<15x4xbf16> to vector<1x15x4xbf16>
    tpu.vector_store %arg10[%c6, %c1_68, %c0_69], %129 {strides = array<i32>} : memref<9x64x4xbf16, #tpu.memory_space<vmem>>, vector<1x15x4xbf16>,
    %130 = vector.extract_strided_slice %2 {offsets = [5, 0, 0], sizes = [1, 16, 4], strides = [1, 1, 1]} : vector<16x16x4xbf16> to vector<1x16x4xbf16>
    %131 = vector.shape_cast %130 : vector<1x16x4xbf16> to vector<16x4xbf16>
    %c6_70 = arith.constant 6 : index
    %c16_71 = arith.constant 16 : index
    %c0_72 = arith.constant 0 : index
    %132 = vector.load %arg10[%c6_70, %c16_71, %c0_72] : memref<9x64x4xbf16, #tpu.memory_space<vmem>>, vector<1x16x4xbf16>
    %133 = vector.shape_cast %132 : vector<1x16x4xbf16> to vector<16x4xbf16>
    %134 = vector.shape_cast %131 : vector<16x4xbf16> to vector<1x16x4xbf16>
    tpu.vector_store %arg10[%c6_70, %c16_71, %c0_72], %134 {strides = array<i32>} : memref<9x64x4xbf16, #tpu.memory_space<vmem>>, vector<1x16x4xbf16>,
    %135 = vector.extract_strided_slice %2 {offsets = [15, 0, 0], sizes = [1, 15, 4], strides = [1, 1, 1]} : vector<16x16x4xbf16> to vector<1x15x4xbf16>
    %136 = vector.shape_cast %135 : vector<1x15x4xbf16> to vector<15x4xbf16>
    %c6_73 = arith.constant 6 : index
    %c33_74 = arith.constant 33 : index
    %c0_75 = arith.constant 0 : index
    %137 = vector.load %arg10[%c6_73, %c33_74, %c0_75] : memref<9x64x4xbf16, #tpu.memory_space<vmem>>, vector<1x15x4xbf16>
    %138 = vector.shape_cast %137 : vector<1x15x4xbf16> to vector<15x4xbf16>
    %139 = vector.shape_cast %136 : vector<15x4xbf16> to vector<1x15x4xbf16>
    tpu.vector_store %arg10[%c6_73, %c33_74, %c0_75], %139 {strides = array<i32>} : memref<9x64x4xbf16, #tpu.memory_space<vmem>>, vector<1x15x4xbf16>,
    %140 = vector.extract_strided_slice %2 {offsets = [13, 0, 0], sizes = [1, 16, 4], strides = [1, 1, 1]} : vector<16x16x4xbf16> to vector<1x16x4xbf16>
    %141 = vector.shape_cast %140 : vector<1x16x4xbf16> to vector<16x4xbf16>
    %c6_76 = arith.constant 6 : index
    %c48_77 = arith.constant 48 : index
    %c0_78 = arith.constant 0 : index
    %142 = vector.load %arg10[%c6_76, %c48_77, %c0_78] : memref<9x64x4xbf16, #tpu.memory_space<vmem>>, vector<1x16x4xbf16>
    %143 = vector.shape_cast %142 : vector<1x16x4xbf16> to vector<16x4xbf16>
    %144 = vector.shape_cast %141 : vector<16x4xbf16> to vector<1x16x4xbf16>
    tpu.vector_store %arg10[%c6_76, %c48_77, %c0_78], %144 {strides = array<i32>} : memref<9x64x4xbf16, #tpu.memory_space<vmem>>, vector<1x16x4xbf16>,
    %145 = vector.extract_strided_slice %2 {offsets = [4, 0, 0], sizes = [1, 16, 4], strides = [1, 1, 1]} : vector<16x16x4xbf16> to vector<1x16x4xbf16>
    %146 = vector.shape_cast %145 : vector<1x16x4xbf16> to vector<16x4xbf16>
    %c7 = arith.constant 7 : index
    %c0_79 = arith.constant 0 : index
    %c0_80 = arith.constant 0 : index
    %147 = vector.load %arg10[%c7, %c0_79, %c0_80] : memref<9x64x4xbf16, #tpu.memory_space<vmem>>, vector<1x16x4xbf16>
    %148 = vector.shape_cast %147 : vector<1x16x4xbf16> to vector<16x4xbf16>
    %149 = vector.shape_cast %146 : vector<16x4xbf16> to vector<1x16x4xbf16>
    tpu.vector_store %arg10[%c7, %c0_79, %c0_80], %149 {strides = array<i32>} : memref<9x64x4xbf16, #tpu.memory_space<vmem>>, vector<1x16x4xbf16>,
    %150 = vector.extract_strided_slice %2 {offsets = [6, 0, 0], sizes = [1, 16, 4], strides = [1, 1, 1]} : vector<16x16x4xbf16> to vector<1x16x4xbf16>
    %151 = vector.shape_cast %150 : vector<1x16x4xbf16> to vector<16x4xbf16>
    %c7_81 = arith.constant 7 : index
    %c16_82 = arith.constant 16 : index
    %c0_83 = arith.constant 0 : index
    %152 = vector.load %arg10[%c7_81, %c16_82, %c0_83] : memref<9x64x4xbf16, #tpu.memory_space<vmem>>, vector<1x16x4xbf16>
    %153 = vector.shape_cast %152 : vector<1x16x4xbf16> to vector<16x4xbf16>
    %154 = vector.shape_cast %151 : vector<16x4xbf16> to vector<1x16x4xbf16>
    tpu.vector_store %arg10[%c7_81, %c16_82, %c0_83], %154 {strides = array<i32>} : memref<9x64x4xbf16, #tpu.memory_space<vmem>>, vector<1x16x4xbf16>,
    %155 = vector.extract_strided_slice %2 {offsets = [12, 0, 0], sizes = [1, 16, 4], strides = [1, 1, 1]} : vector<16x16x4xbf16> to vector<1x16x4xbf16>
    %156 = vector.shape_cast %155 : vector<1x16x4xbf16> to vector<16x4xbf16>
    %c7_84 = arith.constant 7 : index
    %c32_85 = arith.constant 32 : index
    %c0_86 = arith.constant 0 : index
    %157 = vector.load %arg10[%c7_84, %c32_85, %c0_86] : memref<9x64x4xbf16, #tpu.memory_space<vmem>>, vector<1x16x4xbf16>
    %158 = vector.shape_cast %157 : vector<1x16x4xbf16> to vector<16x4xbf16>
    %159 = vector.shape_cast %156 : vector<16x4xbf16> to vector<1x16x4xbf16>
    tpu.vector_store %arg10[%c7_84, %c32_85, %c0_86], %159 {strides = array<i32>} : memref<9x64x4xbf16, #tpu.memory_space<vmem>>, vector<1x16x4xbf16>,
    %160 = vector.extract_strided_slice %2 {offsets = [14, 0, 0], sizes = [1, 16, 4], strides = [1, 1, 1]} : vector<16x16x4xbf16> to vector<1x16x4xbf16>
    %161 = vector.shape_cast %160 : vector<1x16x4xbf16> to vector<16x4xbf16>
    %c7_87 = arith.constant 7 : index
    %c48_88 = arith.constant 48 : index
    %c0_89 = arith.constant 0 : index
    %162 = vector.load %arg10[%c7_87, %c48_88, %c0_89] : memref<9x64x4xbf16, #tpu.memory_space<vmem>>, vector<1x16x4xbf16>
    %163 = vector.shape_cast %162 : vector<1x16x4xbf16> to vector<16x4xbf16>
    %164 = vector.shape_cast %161 : vector<16x4xbf16> to vector<1x16x4xbf16>
    tpu.vector_store %arg10[%c7_87, %c48_88, %c0_89], %164 {strides = array<i32>} : memref<9x64x4xbf16, #tpu.memory_space<vmem>>, vector<1x16x4xbf16>,
    %165 = vector.extract_strided_slice %2 {offsets = [5, 0, 0], sizes = [1, 16, 4], strides = [1, 1, 1]} : vector<16x16x4xbf16> to vector<1x16x4xbf16>
    %166 = vector.shape_cast %165 : vector<1x16x4xbf16> to vector<16x4xbf16>
    %c8 = arith.constant 8 : index
    %c0_90 = arith.constant 0 : index
    %c0_91 = arith.constant 0 : index
    %167 = vector.load %arg10[%c8, %c0_90, %c0_91] : memref<9x64x4xbf16, #tpu.memory_space<vmem>>, vector<1x16x4xbf16>
    %168 = vector.shape_cast %167 : vector<1x16x4xbf16> to vector<16x4xbf16>
    %169 = vector.shape_cast %166 : vector<16x4xbf16> to vector<1x16x4xbf16>
    tpu.vector_store %arg10[%c8, %c0_90, %c0_91], %169 {strides = array<i32>} : memref<9x64x4xbf16, #tpu.memory_space<vmem>>, vector<1x16x4xbf16>,
    %170 = vector.extract_strided_slice %2 {offsets = [7, 0, 0], sizes = [1, 16, 4], strides = [1, 1, 1]} : vector<16x16x4xbf16> to vector<1x16x4xbf16>
    %171 = vector.shape_cast %170 : vector<1x16x4xbf16> to vector<16x4xbf16>
    %c8_92 = arith.constant 8 : index
    %c16_93 = arith.constant 16 : index
    %c0_94 = arith.constant 0 : index
    %172 = vector.load %arg10[%c8_92, %c16_93, %c0_94] : memref<9x64x4xbf16, #tpu.memory_space<vmem>>, vector<1x16x4xbf16>
    %173 = vector.shape_cast %172 : vector<1x16x4xbf16> to vector<16x4xbf16>
    %174 = vector.shape_cast %171 : vector<16x4xbf16> to vector<1x16x4xbf16>
    tpu.vector_store %arg10[%c8_92, %c16_93, %c0_94], %174 {strides = array<i32>} : memref<9x64x4xbf16, #tpu.memory_space<vmem>>, vector<1x16x4xbf16>,
    %175 = vector.extract_strided_slice %2 {offsets = [13, 0, 0], sizes = [1, 16, 4], strides = [1, 1, 1]} : vector<16x16x4xbf16> to vector<1x16x4xbf16>
    %176 = vector.shape_cast %175 : vector<1x16x4xbf16> to vector<16x4xbf16>
    %c8_95 = arith.constant 8 : index
    %c32_96 = arith.constant 32 : index
    %c0_97 = arith.constant 0 : index
    %177 = vector.load %arg10[%c8_95, %c32_96, %c0_97] : memref<9x64x4xbf16, #tpu.memory_space<vmem>>, vector<1x16x4xbf16>
    %178 = vector.shape_cast %177 : vector<1x16x4xbf16> to vector<16x4xbf16>
    %179 = vector.shape_cast %176 : vector<16x4xbf16> to vector<1x16x4xbf16>
    tpu.vector_store %arg10[%c8_95, %c32_96, %c0_97], %179 {strides = array<i32>} : memref<9x64x4xbf16, #tpu.memory_space<vmem>>, vector<1x16x4xbf16>,
    %180 = vector.extract_strided_slice %2 {offsets = [15, 0, 0], sizes = [1, 16, 4], strides = [1, 1, 1]} : vector<16x16x4xbf16> to vector<1x16x4xbf16>
    %181 = vector.shape_cast %180 : vector<1x16x4xbf16> to vector<16x4xbf16>
    %c8_98 = arith.constant 8 : index
    %c48_99 = arith.constant 48 : index
    %c0_100 = arith.constant 0 : index
    %182 = vector.load %arg10[%c8_98, %c48_99, %c0_100] : memref<9x64x4xbf16, #tpu.memory_space<vmem>>, vector<1x16x4xbf16>
    %183 = vector.shape_cast %182 : vector<1x16x4xbf16> to vector<16x4xbf16>
    %184 = vector.shape_cast %181 : vector<16x4xbf16> to vector<1x16x4xbf16>
    tpu.vector_store %arg10[%c8_98, %c48_99, %c0_100], %184 {strides = array<i32>} : memref<9x64x4xbf16, #tpu.memory_space<vmem>>, vector<1x16x4xbf16>,
    %c0_101 = arith.constant 0 : index
    %c0_102 = arith.constant 0 : index
    %185 = vector.load %arg6[%c0_101, %c0_102] : memref<64x1xbf16, #tpu.memory_space<vmem>>, vector<64x1xbf16>
    %c0_103 = arith.constant 0 : index
    %c0_104 = arith.constant 0 : index
    %186 = vector.load %arg3[%c0_103, %c0_104] : memref<1x8xf32, #tpu.memory_space<vmem>>, vector<1x8xf32>
    %187 = vector.shape_cast %186 : vector<1x8xf32> to vector<1x8xf32>
    %188 = vector.broadcast %187 : vector<1x8xf32> to vector<64x8xf32>
    %c0_105 = arith.constant 0 : index
    %c0_106 = arith.constant 0 : index
    %c0_107 = arith.constant 0 : index
    %189 = vector.load %arg10[%c0_105, %c0_106, %c0_107] : memref<9x64x4xbf16, #tpu.memory_space<vmem>>, vector<1x64x4xbf16>
    %190 = vector.shape_cast %189 : vector<1x64x4xbf16> to vector<64x4xbf16>
    %191 = vector.broadcast %185 : vector<64x1xbf16> to vector<64x4xbf16>
    %192 = arith.mulf %190, %191 : vector<64x4xbf16>
    %c0_108 = arith.constant 0 : index
    %c0_109 = arith.constant 0 : index
    %c0_110 = arith.constant 0 : index
    %193 = vector.load %arg2[%c0_108, %c0_109, %c0_110] : memref<9x4x8xbf16, #tpu.memory_space<vmem>>, vector<1x4x8xbf16>
    %194 = vector.shape_cast %193 : vector<1x4x8xbf16> to vector<4x8xbf16>
    %cst_111 = arith.constant dense<0.000000e+00> : vector<64x8xf32>
    %195 = tpu.matmul %192, %194, %cst_111 {dimension_numbers = #tpu.dot_dimension_numbers<[1], [0], [0], [1], [0, 0, 1, 1], [], []>} : vector<64x4xbf16>, vector<4x8xbf16>, vector<64x8xf32> -> vector<64x8xf32>
    %196 = arith.addf %188, %195 : vector<64x8xf32>
    %c1_112 = arith.constant 1 : index
    %c0_113 = arith.constant 0 : index
    %c0_114 = arith.constant 0 : index
    %197 = vector.load %arg10[%c1_112, %c0_113, %c0_114] : memref<9x64x4xbf16, #tpu.memory_space<vmem>>, vector<1x64x4xbf16>
    %198 = vector.shape_cast %197 : vector<1x64x4xbf16> to vector<64x4xbf16>
    %c1_115 = arith.constant 1 : index
    %c0_116 = arith.constant 0 : index
    %c0_117 = arith.constant 0 : index
    %199 = vector.load %arg2[%c1_115, %c0_116, %c0_117] : memref<9x4x8xbf16, #tpu.memory_space<vmem>>, vector<1x4x8xbf16>
    %200 = vector.shape_cast %199 : vector<1x4x8xbf16> to vector<4x8xbf16>
    %cst_118 = arith.constant dense<0.000000e+00> : vector<64x8xf32>
    %201 = tpu.matmul %198, %200, %cst_118 {dimension_numbers = #tpu.dot_dimension_numbers<[1], [0], [0], [1], [0, 0, 1, 1], [], []>} : vector<64x4xbf16>, vector<4x8xbf16>, vector<64x8xf32> -> vector<64x8xf32>
    %202 = arith.addf %196, %201 : vector<64x8xf32>
    %c2_119 = arith.constant 2 : index
    %c0_120 = arith.constant 0 : index
    %c0_121 = arith.constant 0 : index
    %203 = vector.load %arg10[%c2_119, %c0_120, %c0_121] : memref<9x64x4xbf16, #tpu.memory_space<vmem>>, vector<1x64x4xbf16>
    %204 = vector.shape_cast %203 : vector<1x64x4xbf16> to vector<64x4xbf16>
    %c2_122 = arith.constant 2 : index
    %c0_123 = arith.constant 0 : index
    %c0_124 = arith.constant 0 : index
    %205 = vector.load %arg2[%c2_122, %c0_123, %c0_124] : memref<9x4x8xbf16, #tpu.memory_space<vmem>>, vector<1x4x8xbf16>
    %206 = vector.shape_cast %205 : vector<1x4x8xbf16> to vector<4x8xbf16>
    %cst_125 = arith.constant dense<0.000000e+00> : vector<64x8xf32>
    %207 = tpu.matmul %204, %206, %cst_125 {dimension_numbers = #tpu.dot_dimension_numbers<[1], [0], [0], [1], [0, 0, 1, 1], [], []>} : vector<64x4xbf16>, vector<4x8xbf16>, vector<64x8xf32> -> vector<64x8xf32>
    %208 = arith.addf %202, %207 : vector<64x8xf32>
    %c3_126 = arith.constant 3 : index
    %c0_127 = arith.constant 0 : index
    %c0_128 = arith.constant 0 : index
    %209 = vector.load %arg10[%c3_126, %c0_127, %c0_128] : memref<9x64x4xbf16, #tpu.memory_space<vmem>>, vector<1x64x4xbf16>
    %210 = vector.shape_cast %209 : vector<1x64x4xbf16> to vector<64x4xbf16>
    %211 = vector.broadcast %185 : vector<64x1xbf16> to vector<64x4xbf16>
    %212 = arith.mulf %210, %211 : vector<64x4xbf16>
    %c3_129 = arith.constant 3 : index
    %c0_130 = arith.constant 0 : index
    %c0_131 = arith.constant 0 : index
    %213 = vector.load %arg2[%c3_129, %c0_130, %c0_131] : memref<9x4x8xbf16, #tpu.memory_space<vmem>>, vector<1x4x8xbf16>
    %214 = vector.shape_cast %213 : vector<1x4x8xbf16> to vector<4x8xbf16>
    %cst_132 = arith.constant dense<0.000000e+00> : vector<64x8xf32>
    %215 = tpu.matmul %212, %214, %cst_132 {dimension_numbers = #tpu.dot_dimension_numbers<[1], [0], [0], [1], [0, 0, 1, 1], [], []>} : vector<64x4xbf16>, vector<4x8xbf16>, vector<64x8xf32> -> vector<64x8xf32>
    %216 = arith.addf %208, %215 : vector<64x8xf32>
    %c4_133 = arith.constant 4 : index
    %c0_134 = arith.constant 0 : index
    %c0_135 = arith.constant 0 : index
    %217 = vector.load %arg10[%c4_133, %c0_134, %c0_135] : memref<9x64x4xbf16, #tpu.memory_space<vmem>>, vector<1x64x4xbf16>
    %218 = vector.shape_cast %217 : vector<1x64x4xbf16> to vector<64x4xbf16>
    %c4_136 = arith.constant 4 : index
    %c0_137 = arith.constant 0 : index
    %c0_138 = arith.constant 0 : index
    %219 = vector.load %arg2[%c4_136, %c0_137, %c0_138] : memref<9x4x8xbf16, #tpu.memory_space<vmem>>, vector<1x4x8xbf16>
    %220 = vector.shape_cast %219 : vector<1x4x8xbf16> to vector<4x8xbf16>
    %cst_139 = arith.constant dense<0.000000e+00> : vector<64x8xf32>
    %221 = tpu.matmul %218, %220, %cst_139 {dimension_numbers = #tpu.dot_dimension_numbers<[1], [0], [0], [1], [0, 0, 1, 1], [], []>} : vector<64x4xbf16>, vector<4x8xbf16>, vector<64x8xf32> -> vector<64x8xf32>
    %222 = arith.addf %216, %221 : vector<64x8xf32>
    %c5_140 = arith.constant 5 : index
    %c0_141 = arith.constant 0 : index
    %c0_142 = arith.constant 0 : index
    %223 = vector.load %arg10[%c5_140, %c0_141, %c0_142] : memref<9x64x4xbf16, #tpu.memory_space<vmem>>, vector<1x64x4xbf16>
    %224 = vector.shape_cast %223 : vector<1x64x4xbf16> to vector<64x4xbf16>
    %c5_143 = arith.constant 5 : index
    %c0_144 = arith.constant 0 : index
    %c0_145 = arith.constant 0 : index
    %225 = vector.load %arg2[%c5_143, %c0_144, %c0_145] : memref<9x4x8xbf16, #tpu.memory_space<vmem>>, vector<1x4x8xbf16>
    %226 = vector.shape_cast %225 : vector<1x4x8xbf16> to vector<4x8xbf16>
    %cst_146 = arith.constant dense<0.000000e+00> : vector<64x8xf32>
    %227 = tpu.matmul %224, %226, %cst_146 {dimension_numbers = #tpu.dot_dimension_numbers<[1], [0], [0], [1], [0, 0, 1, 1], [], []>} : vector<64x4xbf16>, vector<4x8xbf16>, vector<64x8xf32> -> vector<64x8xf32>
    %228 = arith.addf %222, %227 : vector<64x8xf32>
    %c6_147 = arith.constant 6 : index
    %c0_148 = arith.constant 0 : index
    %c0_149 = arith.constant 0 : index
    %229 = vector.load %arg10[%c6_147, %c0_148, %c0_149] : memref<9x64x4xbf16, #tpu.memory_space<vmem>>, vector<1x64x4xbf16>
    %230 = vector.shape_cast %229 : vector<1x64x4xbf16> to vector<64x4xbf16>
    %231 = vector.broadcast %185 : vector<64x1xbf16> to vector<64x4xbf16>
    %232 = arith.mulf %230, %231 : vector<64x4xbf16>
    %c6_150 = arith.constant 6 : index
    %c0_151 = arith.constant 0 : index
    %c0_152 = arith.constant 0 : index
    %233 = vector.load %arg2[%c6_150, %c0_151, %c0_152] : memref<9x4x8xbf16, #tpu.memory_space<vmem>>, vector<1x4x8xbf16>
    %234 = vector.shape_cast %233 : vector<1x4x8xbf16> to vector<4x8xbf16>
    %cst_153 = arith.constant dense<0.000000e+00> : vector<64x8xf32>
    %235 = tpu.matmul %232, %234, %cst_153 {dimension_numbers = #tpu.dot_dimension_numbers<[1], [0], [0], [1], [0, 0, 1, 1], [], []>} : vector<64x4xbf16>, vector<4x8xbf16>, vector<64x8xf32> -> vector<64x8xf32>
    %236 = arith.addf %228, %235 : vector<64x8xf32>
    %c7_154 = arith.constant 7 : index
    %c0_155 = arith.constant 0 : index
    %c0_156 = arith.constant 0 : index
    %237 = vector.load %arg10[%c7_154, %c0_155, %c0_156] : memref<9x64x4xbf16, #tpu.memory_space<vmem>>, vector<1x64x4xbf16>
    %238 = vector.shape_cast %237 : vector<1x64x4xbf16> to vector<64x4xbf16>
    %c7_157 = arith.constant 7 : index
    %c0_158 = arith.constant 0 : index
    %c0_159 = arith.constant 0 : index
    %239 = vector.load %arg2[%c7_157, %c0_158, %c0_159] : memref<9x4x8xbf16, #tpu.memory_space<vmem>>, vector<1x4x8xbf16>
    %240 = vector.shape_cast %239 : vector<1x4x8xbf16> to vector<4x8xbf16>
    %cst_160 = arith.constant dense<0.000000e+00> : vector<64x8xf32>
    %241 = tpu.matmul %238, %240, %cst_160 {dimension_numbers = #tpu.dot_dimension_numbers<[1], [0], [0], [1], [0, 0, 1, 1], [], []>} : vector<64x4xbf16>, vector<4x8xbf16>, vector<64x8xf32> -> vector<64x8xf32>
    %242 = arith.addf %236, %241 : vector<64x8xf32>
    %c8_161 = arith.constant 8 : index
    %c0_162 = arith.constant 0 : index
    %c0_163 = arith.constant 0 : index
    %243 = vector.load %arg10[%c8_161, %c0_162, %c0_163] : memref<9x64x4xbf16, #tpu.memory_space<vmem>>, vector<1x64x4xbf16>
    %244 = vector.shape_cast %243 : vector<1x64x4xbf16> to vector<64x4xbf16>
    %c8_164 = arith.constant 8 : index
    %c0_165 = arith.constant 0 : index
    %c0_166 = arith.constant 0 : index
    %245 = vector.load %arg2[%c8_164, %c0_165, %c0_166] : memref<9x4x8xbf16, #tpu.memory_space<vmem>>, vector<1x4x8xbf16>
    %246 = vector.shape_cast %245 : vector<1x4x8xbf16> to vector<4x8xbf16>
    %cst_167 = arith.constant dense<0.000000e+00> : vector<64x8xf32>
    %247 = tpu.matmul %244, %246, %cst_167 {dimension_numbers = #tpu.dot_dimension_numbers<[1], [0], [0], [1], [0, 0, 1, 1], [], []>} : vector<64x4xbf16>, vector<4x8xbf16>, vector<64x8xf32> -> vector<64x8xf32>
    %248 = arith.addf %242, %247 : vector<64x8xf32>
    %c0_168 = arith.constant 0 : index
    %c0_169 = arith.constant 0 : index
    %c0_170 = arith.constant 0 : index
    %249 = vector.load %arg8[%c0_168, %c0_169, %c0_170] : memref<1x64x8xf32, #tpu.memory_space<vmem>>, vector<1x64x8xf32>
    %250 = vector.shape_cast %249 : vector<1x64x8xf32> to vector<64x8xf32>
    %251 = vector.shape_cast %248 : vector<64x8xf32> to vector<1x64x8xf32>
    tpu.vector_store %arg8[%c0_168, %c0_169, %c0_170], %251 {strides = array<i32>} : memref<1x64x8xf32, #tpu.memory_space<vmem>>, vector<1x64x8xf32>,
    %cst_171 = arith.constant 0.000000e+00 : f32
    %252 = vector.broadcast %cst_171 : f32 to vector<64x8xf32>
    %253 = arith.maximumf %248, %252 : vector<64x8xf32>
    %254 = arith.truncf %253 : vector<64x8xf32> to vector<64x8xbf16>
    %cst_172 = arith.constant 0.000000e+00 : bf16
    %255 = vector.broadcast %cst_172 : bf16 to vector<9x16x8xbf16>
    %c0_173 = arith.constant 0 : index
    %c0_174 = arith.constant 0 : index
    %c0_175 = arith.constant 0 : index
    %256 = vector.load %arg11[%c0_173, %c0_174, %c0_175] : memref<9x16x8xbf16, #tpu.memory_space<vmem>>, vector<9x16x8xbf16>
    tpu.vector_store %arg11[%c0_173, %c0_174, %c0_175], %255 {strides = array<i32>} : memref<9x16x8xbf16, #tpu.memory_space<vmem>>, vector<9x16x8xbf16>,
    %257 = vector.extract_strided_slice %254 {offsets = [48, 0], sizes = [11, 8], strides = [1, 1]} : vector<64x8xbf16> to vector<11x8xbf16>
    %c0_176 = arith.constant 0 : index
    %c5_177 = arith.constant 5 : index
    %c0_178 = arith.constant 0 : index
    %258 = vector.load %arg11[%c0_176, %c5_177, %c0_178] : memref<9x16x8xbf16, #tpu.memory_space<vmem>>, vector<1x11x8xbf16>
    %259 = vector.shape_cast %258 : vector<1x11x8xbf16> to vector<11x8xbf16>
    %260 = vector.shape_cast %257 : vector<11x8xbf16> to vector<1x11x8xbf16>
    tpu.vector_store %arg11[%c0_176, %c5_177, %c0_178], %260 {strides = array<i32>} : memref<9x16x8xbf16, #tpu.memory_space<vmem>>, vector<1x11x8xbf16>,
    %261 = vector.extract_strided_slice %254 {offsets = [32, 0], sizes = [12, 8], strides = [1, 1]} : vector<64x8xbf16> to vector<12x8xbf16>
    %c1_179 = arith.constant 1 : index
    %c4_180 = arith.constant 4 : index
    %c0_181 = arith.constant 0 : index
    %262 = vector.load %arg11[%c1_179, %c4_180, %c0_181] : memref<9x16x8xbf16, #tpu.memory_space<vmem>>, vector<1x12x8xbf16>
    %263 = vector.shape_cast %262 : vector<1x12x8xbf16> to vector<12x8xbf16>
    %264 = vector.shape_cast %261 : vector<12x8xbf16> to vector<1x12x8xbf16>
    tpu.vector_store %arg11[%c1_179, %c4_180, %c0_181], %264 {strides = array<i32>} : memref<9x16x8xbf16, #tpu.memory_space<vmem>>, vector<1x12x8xbf16>,
    %265 = vector.extract_strided_slice %254 {offsets = [48, 0], sizes = [12, 8], strides = [1, 1]} : vector<64x8xbf16> to vector<12x8xbf16>
    %c2_182 = arith.constant 2 : index
    %c4_183 = arith.constant 4 : index
    %c0_184 = arith.constant 0 : index
    %266 = vector.load %arg11[%c2_182, %c4_183, %c0_184] : memref<9x16x8xbf16, #tpu.memory_space<vmem>>, vector<1x12x8xbf16>
    %267 = vector.shape_cast %266 : vector<1x12x8xbf16> to vector<12x8xbf16>
    %268 = vector.shape_cast %265 : vector<12x8xbf16> to vector<1x12x8xbf16>
    tpu.vector_store %arg11[%c2_182, %c4_183, %c0_184], %268 {strides = array<i32>} : memref<9x16x8xbf16, #tpu.memory_space<vmem>>, vector<1x12x8xbf16>,
    %269 = vector.extract_strided_slice %254 {offsets = [16, 0], sizes = [15, 8], strides = [1, 1]} : vector<64x8xbf16> to vector<15x8xbf16>
    %c3_185 = arith.constant 3 : index
    %c1_186 = arith.constant 1 : index
    %c0_187 = arith.constant 0 : index
    %270 = vector.load %arg11[%c3_185, %c1_186, %c0_187] : memref<9x16x8xbf16, #tpu.memory_space<vmem>>, vector<1x15x8xbf16>
    %271 = vector.shape_cast %270 : vector<1x15x8xbf16> to vector<15x8xbf16>
    %272 = vector.shape_cast %269 : vector<15x8xbf16> to vector<1x15x8xbf16>
    tpu.vector_store %arg11[%c3_185, %c1_186, %c0_187], %272 {strides = array<i32>} : memref<9x16x8xbf16, #tpu.memory_space<vmem>>, vector<1x15x8xbf16>,
    %273 = vector.extract_strided_slice %254 {offsets = [0, 0], sizes = [16, 8], strides = [1, 1]} : vector<64x8xbf16> to vector<16x8xbf16>
    %c4_188 = arith.constant 4 : index
    %c0_189 = arith.constant 0 : index
    %c0_190 = arith.constant 0 : index
    %274 = vector.load %arg11[%c4_188, %c0_189, %c0_190] : memref<9x16x8xbf16, #tpu.memory_space<vmem>>, vector<1x16x8xbf16>
    %275 = vector.shape_cast %274 : vector<1x16x8xbf16> to vector<16x8xbf16>
    %276 = vector.shape_cast %273 : vector<16x8xbf16> to vector<1x16x8xbf16>
    tpu.vector_store %arg11[%c4_188, %c0_189, %c0_190], %276 {strides = array<i32>} : memref<9x16x8xbf16, #tpu.memory_space<vmem>>, vector<1x16x8xbf16>,
    %277 = vector.extract_strided_slice %254 {offsets = [16, 0], sizes = [16, 8], strides = [1, 1]} : vector<64x8xbf16> to vector<16x8xbf16>
    %c5_191 = arith.constant 5 : index
    %c0_192 = arith.constant 0 : index
    %c0_193 = arith.constant 0 : index
    %278 = vector.load %arg11[%c5_191, %c0_192, %c0_193] : memref<9x16x8xbf16, #tpu.memory_space<vmem>>, vector<1x16x8xbf16>
    %279 = vector.shape_cast %278 : vector<1x16x8xbf16> to vector<16x8xbf16>
    %280 = vector.shape_cast %277 : vector<16x8xbf16> to vector<1x16x8xbf16>
    tpu.vector_store %arg11[%c5_191, %c0_192, %c0_193], %280 {strides = array<i32>} : memref<9x16x8xbf16, #tpu.memory_space<vmem>>, vector<1x16x8xbf16>,
    %281 = vector.extract_strided_slice %254 {offsets = [48, 0], sizes = [15, 8], strides = [1, 1]} : vector<64x8xbf16> to vector<15x8xbf16>
    %c6_194 = arith.constant 6 : index
    %c1_195 = arith.constant 1 : index
    %c0_196 = arith.constant 0 : index
    %282 = vector.load %arg11[%c6_194, %c1_195, %c0_196] : memref<9x16x8xbf16, #tpu.memory_space<vmem>>, vector<1x15x8xbf16>
    %283 = vector.shape_cast %282 : vector<1x15x8xbf16> to vector<15x8xbf16>
    %284 = vector.shape_cast %281 : vector<15x8xbf16> to vector<1x15x8xbf16>
    tpu.vector_store %arg11[%c6_194, %c1_195, %c0_196], %284 {strides = array<i32>} : memref<9x16x8xbf16, #tpu.memory_space<vmem>>, vector<1x15x8xbf16>,
    %285 = vector.extract_strided_slice %254 {offsets = [32, 0], sizes = [16, 8], strides = [1, 1]} : vector<64x8xbf16> to vector<16x8xbf16>
    %c7_197 = arith.constant 7 : index
    %c0_198 = arith.constant 0 : index
    %c0_199 = arith.constant 0 : index
    %286 = vector.load %arg11[%c7_197, %c0_198, %c0_199] : memref<9x16x8xbf16, #tpu.memory_space<vmem>>, vector<1x16x8xbf16>
    %287 = vector.shape_cast %286 : vector<1x16x8xbf16> to vector<16x8xbf16>
    %288 = vector.shape_cast %285 : vector<16x8xbf16> to vector<1x16x8xbf16>
    tpu.vector_store %arg11[%c7_197, %c0_198, %c0_199], %288 {strides = array<i32>} : memref<9x16x8xbf16, #tpu.memory_space<vmem>>, vector<1x16x8xbf16>,
    %289 = vector.extract_strided_slice %254 {offsets = [48, 0], sizes = [16, 8], strides = [1, 1]} : vector<64x8xbf16> to vector<16x8xbf16>
    %c8_200 = arith.constant 8 : index
    %c0_201 = arith.constant 0 : index
    %c0_202 = arith.constant 0 : index
    %290 = vector.load %arg11[%c8_200, %c0_201, %c0_202] : memref<9x16x8xbf16, #tpu.memory_space<vmem>>, vector<1x16x8xbf16>
    %291 = vector.shape_cast %290 : vector<1x16x8xbf16> to vector<16x8xbf16>
    %292 = vector.shape_cast %289 : vector<16x8xbf16> to vector<1x16x8xbf16>
    tpu.vector_store %arg11[%c8_200, %c0_201, %c0_202], %292 {strides = array<i32>} : memref<9x16x8xbf16, #tpu.memory_space<vmem>>, vector<1x16x8xbf16>,
    %c0_203 = arith.constant 0 : index
    %c0_204 = arith.constant 0 : index
    %293 = vector.load %arg7[%c0_203, %c0_204] : memref<16x1xbf16, #tpu.memory_space<vmem>>, vector<16x1xbf16>
    %c0_205 = arith.constant 0 : index
    %c0_206 = arith.constant 0 : index
    %294 = vector.load %arg5[%c0_205, %c0_206] : memref<1x8xf32, #tpu.memory_space<vmem>>, vector<1x8xf32>
    %295 = vector.shape_cast %294 : vector<1x8xf32> to vector<1x8xf32>
    %296 = vector.broadcast %295 : vector<1x8xf32> to vector<16x8xf32>
    %c0_207 = arith.constant 0 : index
    %c0_208 = arith.constant 0 : index
    %c0_209 = arith.constant 0 : index
    %297 = vector.load %arg11[%c0_207, %c0_208, %c0_209] : memref<9x16x8xbf16, #tpu.memory_space<vmem>>, vector<1x16x8xbf16>
    %298 = vector.shape_cast %297 : vector<1x16x8xbf16> to vector<16x8xbf16>
    %299 = vector.broadcast %293 : vector<16x1xbf16> to vector<16x8xbf16>
    %300 = arith.mulf %298, %299 : vector<16x8xbf16>
    %c0_210 = arith.constant 0 : index
    %c0_211 = arith.constant 0 : index
    %c0_212 = arith.constant 0 : index
    %301 = vector.load %arg4[%c0_210, %c0_211, %c0_212] : memref<9x8x8xbf16, #tpu.memory_space<vmem>>, vector<1x8x8xbf16>
    %302 = vector.shape_cast %301 : vector<1x8x8xbf16> to vector<8x8xbf16>
    %cst_213 = arith.constant dense<0.000000e+00> : vector<16x8xf32>
    %303 = tpu.matmul %300, %302, %cst_213 {dimension_numbers = #tpu.dot_dimension_numbers<[1], [0], [0], [1], [0, 0, 1, 1], [], []>} : vector<16x8xbf16>, vector<8x8xbf16>, vector<16x8xf32> -> vector<16x8xf32>
    %304 = arith.addf %296, %303 : vector<16x8xf32>
    %c1_214 = arith.constant 1 : index
    %c0_215 = arith.constant 0 : index
    %c0_216 = arith.constant 0 : index
    %305 = vector.load %arg11[%c1_214, %c0_215, %c0_216] : memref<9x16x8xbf16, #tpu.memory_space<vmem>>, vector<1x16x8xbf16>
    %306 = vector.shape_cast %305 : vector<1x16x8xbf16> to vector<16x8xbf16>
    %c1_217 = arith.constant 1 : index
    %c0_218 = arith.constant 0 : index
    %c0_219 = arith.constant 0 : index
    %307 = vector.load %arg4[%c1_217, %c0_218, %c0_219] : memref<9x8x8xbf16, #tpu.memory_space<vmem>>, vector<1x8x8xbf16>
    %308 = vector.shape_cast %307 : vector<1x8x8xbf16> to vector<8x8xbf16>
    %cst_220 = arith.constant dense<0.000000e+00> : vector<16x8xf32>
    %309 = tpu.matmul %306, %308, %cst_220 {dimension_numbers = #tpu.dot_dimension_numbers<[1], [0], [0], [1], [0, 0, 1, 1], [], []>} : vector<16x8xbf16>, vector<8x8xbf16>, vector<16x8xf32> -> vector<16x8xf32>
    %310 = arith.addf %304, %309 : vector<16x8xf32>
    %c2_221 = arith.constant 2 : index
    %c0_222 = arith.constant 0 : index
    %c0_223 = arith.constant 0 : index
    %311 = vector.load %arg11[%c2_221, %c0_222, %c0_223] : memref<9x16x8xbf16, #tpu.memory_space<vmem>>, vector<1x16x8xbf16>
    %312 = vector.shape_cast %311 : vector<1x16x8xbf16> to vector<16x8xbf16>
    %c2_224 = arith.constant 2 : index
    %c0_225 = arith.constant 0 : index
    %c0_226 = arith.constant 0 : index
    %313 = vector.load %arg4[%c2_224, %c0_225, %c0_226] : memref<9x8x8xbf16, #tpu.memory_space<vmem>>, vector<1x8x8xbf16>
    %314 = vector.shape_cast %313 : vector<1x8x8xbf16> to vector<8x8xbf16>
    %cst_227 = arith.constant dense<0.000000e+00> : vector<16x8xf32>
    %315 = tpu.matmul %312, %314, %cst_227 {dimension_numbers = #tpu.dot_dimension_numbers<[1], [0], [0], [1], [0, 0, 1, 1], [], []>} : vector<16x8xbf16>, vector<8x8xbf16>, vector<16x8xf32> -> vector<16x8xf32>
    %316 = arith.addf %310, %315 : vector<16x8xf32>
    %c3_228 = arith.constant 3 : index
    %c0_229 = arith.constant 0 : index
    %c0_230 = arith.constant 0 : index
    %317 = vector.load %arg11[%c3_228, %c0_229, %c0_230] : memref<9x16x8xbf16, #tpu.memory_space<vmem>>, vector<1x16x8xbf16>
    %318 = vector.shape_cast %317 : vector<1x16x8xbf16> to vector<16x8xbf16>
    %319 = vector.broadcast %293 : vector<16x1xbf16> to vector<16x8xbf16>
    %320 = arith.mulf %318, %319 : vector<16x8xbf16>
    %c3_231 = arith.constant 3 : index
    %c0_232 = arith.constant 0 : index
    %c0_233 = arith.constant 0 : index
    %321 = vector.load %arg4[%c3_231, %c0_232, %c0_233] : memref<9x8x8xbf16, #tpu.memory_space<vmem>>, vector<1x8x8xbf16>
    %322 = vector.shape_cast %321 : vector<1x8x8xbf16> to vector<8x8xbf16>
    %cst_234 = arith.constant dense<0.000000e+00> : vector<16x8xf32>
    %323 = tpu.matmul %320, %322, %cst_234 {dimension_numbers = #tpu.dot_dimension_numbers<[1], [0], [0], [1], [0, 0, 1, 1], [], []>} : vector<16x8xbf16>, vector<8x8xbf16>, vector<16x8xf32> -> vector<16x8xf32>
    %324 = arith.addf %316, %323 : vector<16x8xf32>
    %c4_235 = arith.constant 4 : index
    %c0_236 = arith.constant 0 : index
    %c0_237 = arith.constant 0 : index
    %325 = vector.load %arg11[%c4_235, %c0_236, %c0_237] : memref<9x16x8xbf16, #tpu.memory_space<vmem>>, vector<1x16x8xbf16>
    %326 = vector.shape_cast %325 : vector<1x16x8xbf16> to vector<16x8xbf16>
    %c4_238 = arith.constant 4 : index
    %c0_239 = arith.constant 0 : index
    %c0_240 = arith.constant 0 : index
    %327 = vector.load %arg4[%c4_238, %c0_239, %c0_240] : memref<9x8x8xbf16, #tpu.memory_space<vmem>>, vector<1x8x8xbf16>
    %328 = vector.shape_cast %327 : vector<1x8x8xbf16> to vector<8x8xbf16>
    %cst_241 = arith.constant dense<0.000000e+00> : vector<16x8xf32>
    %329 = tpu.matmul %326, %328, %cst_241 {dimension_numbers = #tpu.dot_dimension_numbers<[1], [0], [0], [1], [0, 0, 1, 1], [], []>} : vector<16x8xbf16>, vector<8x8xbf16>, vector<16x8xf32> -> vector<16x8xf32>
    %330 = arith.addf %324, %329 : vector<16x8xf32>
    %c5_242 = arith.constant 5 : index
    %c0_243 = arith.constant 0 : index
    %c0_244 = arith.constant 0 : index
    %331 = vector.load %arg11[%c5_242, %c0_243, %c0_244] : memref<9x16x8xbf16, #tpu.memory_space<vmem>>, vector<1x16x8xbf16>
    %332 = vector.shape_cast %331 : vector<1x16x8xbf16> to vector<16x8xbf16>
    %c5_245 = arith.constant 5 : index
    %c0_246 = arith.constant 0 : index
    %c0_247 = arith.constant 0 : index
    %333 = vector.load %arg4[%c5_245, %c0_246, %c0_247] : memref<9x8x8xbf16, #tpu.memory_space<vmem>>, vector<1x8x8xbf16>
    %334 = vector.shape_cast %333 : vector<1x8x8xbf16> to vector<8x8xbf16>
    %cst_248 = arith.constant dense<0.000000e+00> : vector<16x8xf32>
    %335 = tpu.matmul %332, %334, %cst_248 {dimension_numbers = #tpu.dot_dimension_numbers<[1], [0], [0], [1], [0, 0, 1, 1], [], []>} : vector<16x8xbf16>, vector<8x8xbf16>, vector<16x8xf32> -> vector<16x8xf32>
    %336 = arith.addf %330, %335 : vector<16x8xf32>
    %c6_249 = arith.constant 6 : index
    %c0_250 = arith.constant 0 : index
    %c0_251 = arith.constant 0 : index
    %337 = vector.load %arg11[%c6_249, %c0_250, %c0_251] : memref<9x16x8xbf16, #tpu.memory_space<vmem>>, vector<1x16x8xbf16>
    %338 = vector.shape_cast %337 : vector<1x16x8xbf16> to vector<16x8xbf16>
    %339 = vector.broadcast %293 : vector<16x1xbf16> to vector<16x8xbf16>
    %340 = arith.mulf %338, %339 : vector<16x8xbf16>
    %c6_252 = arith.constant 6 : index
    %c0_253 = arith.constant 0 : index
    %c0_254 = arith.constant 0 : index
    %341 = vector.load %arg4[%c6_252, %c0_253, %c0_254] : memref<9x8x8xbf16, #tpu.memory_space<vmem>>, vector<1x8x8xbf16>
    %342 = vector.shape_cast %341 : vector<1x8x8xbf16> to vector<8x8xbf16>
    %cst_255 = arith.constant dense<0.000000e+00> : vector<16x8xf32>
    %343 = tpu.matmul %340, %342, %cst_255 {dimension_numbers = #tpu.dot_dimension_numbers<[1], [0], [0], [1], [0, 0, 1, 1], [], []>} : vector<16x8xbf16>, vector<8x8xbf16>, vector<16x8xf32> -> vector<16x8xf32>
    %344 = arith.addf %336, %343 : vector<16x8xf32>
    %c7_256 = arith.constant 7 : index
    %c0_257 = arith.constant 0 : index
    %c0_258 = arith.constant 0 : index
    %345 = vector.load %arg11[%c7_256, %c0_257, %c0_258] : memref<9x16x8xbf16, #tpu.memory_space<vmem>>, vector<1x16x8xbf16>
    %346 = vector.shape_cast %345 : vector<1x16x8xbf16> to vector<16x8xbf16>
    %c7_259 = arith.constant 7 : index
    %c0_260 = arith.constant 0 : index
    %c0_261 = arith.constant 0 : index
    %347 = vector.load %arg4[%c7_259, %c0_260, %c0_261] : memref<9x8x8xbf16, #tpu.memory_space<vmem>>, vector<1x8x8xbf16>
    %348 = vector.shape_cast %347 : vector<1x8x8xbf16> to vector<8x8xbf16>
    %cst_262 = arith.constant dense<0.000000e+00> : vector<16x8xf32>
    %349 = tpu.matmul %346, %348, %cst_262 {dimension_numbers = #tpu.dot_dimension_numbers<[1], [0], [0], [1], [0, 0, 1, 1], [], []>} : vector<16x8xbf16>, vector<8x8xbf16>, vector<16x8xf32> -> vector<16x8xf32>
    %350 = arith.addf %344, %349 : vector<16x8xf32>
    %c8_263 = arith.constant 8 : index
    %c0_264 = arith.constant 0 : index
    %c0_265 = arith.constant 0 : index
    %351 = vector.load %arg11[%c8_263, %c0_264, %c0_265] : memref<9x16x8xbf16, #tpu.memory_space<vmem>>, vector<1x16x8xbf16>
    %352 = vector.shape_cast %351 : vector<1x16x8xbf16> to vector<16x8xbf16>
    %c8_266 = arith.constant 8 : index
    %c0_267 = arith.constant 0 : index
    %c0_268 = arith.constant 0 : index
    %353 = vector.load %arg4[%c8_266, %c0_267, %c0_268] : memref<9x8x8xbf16, #tpu.memory_space<vmem>>, vector<1x8x8xbf16>
    %354 = vector.shape_cast %353 : vector<1x8x8xbf16> to vector<8x8xbf16>
    %cst_269 = arith.constant dense<0.000000e+00> : vector<16x8xf32>
    %355 = tpu.matmul %352, %354, %cst_269 {dimension_numbers = #tpu.dot_dimension_numbers<[1], [0], [0], [1], [0, 0, 1, 1], [], []>} : vector<16x8xbf16>, vector<8x8xbf16>, vector<16x8xf32> -> vector<16x8xf32>
    %356 = arith.addf %350, %355 : vector<16x8xf32>
    %c0_270 = arith.constant 0 : index
    %c0_271 = arith.constant 0 : index
    %c0_272 = arith.constant 0 : index
    %357 = vector.load %arg9[%c0_270, %c0_271, %c0_272] : memref<1x16x8xf32, #tpu.memory_space<vmem>>, vector<1x16x8xf32>
    %358 = vector.shape_cast %357 : vector<1x16x8xf32> to vector<16x8xf32>
    %359 = vector.shape_cast %356 : vector<16x8xf32> to vector<1x16x8xf32>
    tpu.vector_store %arg9[%c0_270, %c0_271, %c0_272], %359 {strides = array<i32>} : memref<1x16x8xf32, #tpu.memory_space<vmem>>, vector<1x16x8xf32>,
    return
  }
  func.func @transform_0(%arg0: i32) -> (i32, i32, i32, i32) {
    %c0_i32 = arith.constant 0 : i32
    %c0_i32_0 = arith.constant 0 : i32
    %c0_i32_1 = arith.constant 0 : i32
    %c0_i32_2 = arith.constant 0 : i32
    return %arg0, %c0_i32, %c0_i32_0, %c0_i32_1 : i32, i32, i32, i32
  }
  func.func @transform_1(%arg0: i32) -> (i32, i32, i32) {
    %c0_i32 = arith.constant 0 : i32
    %c0_i32_0 = arith.constant 0 : i32
    %c0_i32_1 = arith.constant 0 : i32
    %c0_i32_2 = arith.constant 0 : i32
    return %c0_i32, %c0_i32_0, %c0_i32_1 : i32, i32, i32
  }
  func.func @transform_2(%arg0: i32) -> (i32, i32) {
    %c0_i32 = arith.constant 0 : i32
    %c0_i32_0 = arith.constant 0 : i32
    %c0_i32_1 = arith.constant 0 : i32
    return %c0_i32, %c0_i32_0 : i32, i32
  }
  func.func @transform_3(%arg0: i32) -> (i32, i32, i32) {
    %c0_i32 = arith.constant 0 : i32
    %c0_i32_0 = arith.constant 0 : i32
    %c0_i32_1 = arith.constant 0 : i32
    %c0_i32_2 = arith.constant 0 : i32
    return %c0_i32, %c0_i32_0, %c0_i32_1 : i32, i32, i32
  }
  func.func @transform_4(%arg0: i32) -> (i32, i32) {
    %c0_i32 = arith.constant 0 : i32
    %c0_i32_0 = arith.constant 0 : i32
    %c0_i32_1 = arith.constant 0 : i32
    return %c0_i32, %c0_i32_0 : i32, i32
  }
  func.func @transform_5(%arg0: i32) -> (i32, i32) {
    %c0_i32 = arith.constant 0 : i32
    %c0_i32_0 = arith.constant 0 : i32
    %c0_i32_1 = arith.constant 0 : i32
    return %c0_i32, %c0_i32_0 : i32, i32
  }
  func.func @transform_6(%arg0: i32) -> (i32, i32) {
    %c0_i32 = arith.constant 0 : i32
    %c0_i32_0 = arith.constant 0 : i32
    %c0_i32_1 = arith.constant 0 : i32
    return %c0_i32, %c0_i32_0 : i32, i32
  }
  func.func @transform_7(%arg0: i32) -> (i32, i32, i32) {
    %c0_i32 = arith.constant 0 : i32
    %c0_i32_0 = arith.constant 0 : i32
    %c0_i32_1 = arith.constant 0 : i32
    return %arg0, %c0_i32, %c0_i32_0 : i32, i32, i32
  }
  func.func @transform_8(%arg0: i32) -> (i32, i32, i32) {
    %c0_i32 = arith.constant 0 : i32
    %c0_i32_0 = arith.constant 0 : i32
    %c0_i32_1 = arith.constant 0 : i32
    return %arg0, %c0_i32, %c0_i32_0 : i32, i32, i32
  }
}

</mosaic_0001>

<bundles_post_ra>
// kernel: last_level_p6p7.1
= control target key start
LH: loop header
LB: loop body
LE: loop exit
PB: predicated region body
PF: predicated region fallthrough
CT: control target
= control target key end

     0   :  { %14 = vsyncpa [#allocation5], 0  ;;  %s4271_s0 = inlined_call_operand.vmem [shape: f32[2,16,16,4], index: 0, kind: input, shape index: {}]   ;;  %s4272_s1 = inlined_call_operand.vmem [shape: bf16[9,4,8], index: 1, kind: input, shape index: {}]   ;;  %s4273_s2 = inlined_call_operand.vmem [shape: f32[1,8], index: 2, kind: input, shape index: {}]   ;;  %s4274_s3 = inlined_call_operand.vmem [shape: bf16[9,8,8], index: 3, kind: input, shape index: {}]   ;;  %s4275_s4 = inlined_call_operand.vmem [shape: f32[1,8], index: 4, kind: input, shape index: {}]   ;;  %s4276_s5 = inlined_call_operand.vmem [shape: bf16[64,1], index: 5, kind: input, shape index: {}]   ;;  %s4277_s6 = inlined_call_operand.vmem [shape: bf16[16,1], index: 6, kind: input, shape index: {}]   ;;  %s4278_s7 = inlined_call_operand.vmem [shape: f32[2,64,8], index: 7, kind: output, shape index: {0}]   ;;  %s4279_s8 = inlined_call_operand.hbm [shape: f32[2,16,8], index: 8, kind: output, shape index: {1}]  }
   0x1   :  { %16 = vsyncpa [#allocation5 + $0x1], 0  ;;  %s3410_s27 = smov 0   ;;  %s3412_s28 = smov 0  }
   0x2   :  { %s3414_s29 = smov 0   ;;  %s3416_s30 = smov 0  }
   0x3 LB: > { %s3431_s9 = sadd.s32 4294967295, %s3356_s30   ;;  %s2798_s10 = sadd.s32 4294967294, %s3356_s30   ;;  %s3356_s30 = sphi %s3416_s30, %s4323_s30   ;;  %s3352_s29 = sphi %s3414_s29, %s4322_s29   ;;  %s3348_s28 = sphi %s3412_s28, %s4321_s28   ;;  %s3344_s27 = sphi %s3410_s27, %s4320_s27  }
   0x4   : > { %s3435_s11 = sadd.s32 1, %s3356_s30   ;;  %s207_s12 = sadd.s32 1, %s3352_s29 }
   0x5   : > { %s204_s13 = ssub.s32 %s3356_s30, %s3435_s11  ;;  %p217_p0 = scmp.ne.s32.totalorder %s3352_s29, %s3348_s28 }
   0x6   : > { %p205_p1 = scmp.eq.s32.totalorder %s204_s13, 0  ;;  %p218_p2 = scmp.eq.s32.totalorder %s3431_s9, 1 }
   0x7   : > { %p223_p3 = scmp.ne.s32.totalorder %s3348_s28, %s3344_s27  ;;  %p224_p4 = scmp.eq.s32.totalorder %s2798_s10, 1 }
   0x8   : > { %s3446_s14 = scalar_select %p205_p1, %s3352_s29, %s207_s12  }
   0x9   : > { %p3448_p5 = por %p218_p2, %p217_p0  ;;  %p3452_p6 = por %p224_p4, %p223_p3 }
   0xa   : > { %p2801_p7 = scmp.ge.s32.totalorder %s3356_s30, 1  ;;  %p268_p8 = scmp.lt.s32.totalorder %s3356_s30, 3 }
   0xc   : > { %p269_p9 = pnand %p2801_p7, %p268_p8 }
   0xe   : > { %272 = sbr.rel (%p269_p9) target bundleno = 698 (0x2ba), region = 48 }
  0x13   : > { %v767_v0 = vld [vmem:[%s4276_s5 + $0x8] sm:$0xf]  ;;  %v765_v1 = vld [vmem:[%s4276_s5] sm:$0xf]  ;;  %v3358_v2 = vmov 0   ;;  %vm479_vm0 = vcmask 1041408  }
  0x14   : > { %3265 = vset.pattern.permute.xlu1 %v3358_v2  ;;  %3264 = vset.pattern.permute.xlu0 %v3358_v2  ;;  %v3469_v3 = vld [vmem:[%s4276_s5 + $0xc] sm:$0xf]  ;;  %v3474_v4 = vld [vmem:[%s4276_s5 + $0x4] sm:$0xf]  ;;  %v2848_v5 = vld [vmem:[%s4272_s1 + $0x2] sm:$0x3] }
  0x15   : > { %814 = vperm.xlu1 %3265, %v767_v0   ;;  %790 = vperm.xlu0 %3264, %v765_v1   ;;  %v1046_v6 = vsel %vm479_vm0, %v2848_v5, 0  ;;  %p307_p10 = scmp.lt.s32.totalorder %s3431_s9, 1  ;;  %vm366_vm1 = vcmask 27648   ;;  %v770_v7 = vld [vmem:[%s4276_s5 + $0x14] sm:$0xf]  ;;  %vm467_vm2 = vcmask 27650  }
  0x16   : > { %3211 = vmatprep.subr.msk.bf16.mxu1 %vm479_vm0, %v2848_v5  ;;  %375 = vst.msk [vmem:[#allocation2 + $0x20] sm:$0xf] %vm366_vm1, %v3358_v2  ;;  %376 = vst.msk [vmem:[#allocation2 + $0x24] sm:$0xf] %vm366_vm1, %v3358_v2  ;;  %v769_v8 = vld [vmem:[%s4276_s5 + $0x10] sm:$0xf] }
  0x17   : > { %3077 = vmatpush3.bf16.msra.mxu1 %v1046_v6  ;;  %367 = vst.msk [vmem:[#allocation2] sm:$0xf] %vm366_vm1, %v3358_v2  ;;  %368 = vst.msk [vmem:[#allocation2 + $0x4] sm:$0xf] %vm366_vm1, %v3358_v2  ;;  %s3634_s13 = scalar_select %p307_p10, %s3431_s9, 1  ;;  %vm480_vm3 = vcmask 1045508  }
  0x18   : > { %369 = vst.msk [vmem:[#allocation2 + $0x8] sm:$0xf] %vm366_vm1, %v3358_v2  ;;  %370 = vst.msk [vmem:[#allocation2 + $0xc] sm:$0xf] %vm366_vm1, %v3358_v2  ;;  %v892_v9 = vld [vmem:[%s4272_s1] sm:$0x3] }
  0x19   : > { %371 = vst.msk [vmem:[#allocation2 + $0x10] sm:$0xf] %vm366_vm1, %v3358_v2  ;;  %372 = vst.msk [vmem:[#allocation2 + $0x14] sm:$0xf] %vm366_vm1, %v3358_v2  ;;  %826 = vperm.xlu1 %3265, %v3469_v3   ;;  %802 = vperm.xlu0 %3264, %v3474_v4   ;;  %v3645_v10 = vld [vmem:[%s4272_s1 + $0x6] sm:$0x3] }
  0x1a   : > { %373 = vst.msk [vmem:[#allocation2 + $0x18] sm:$0xf] %vm366_vm1, %v3358_v2  ;;  %374 = vst.msk [vmem:[#allocation2 + $0x1c] sm:$0xf] %vm366_vm1, %v3358_v2  ;;  %s2960_s23 = sshll.u32 %s3634_s13, 8  ;;  %3210 = vmatprep.subr.msk.bf16.mxu0 %vm479_vm0, %v892_v9  ;;  %v928_v11 = vsel %vm479_vm0, %v892_v9, 0  ;;  %3213 = vmatprep.subr.msk.bf16.mxu1 %vm479_vm0, %v3645_v10 }
  0x1b   : > { %377 = vst.msk [vmem:[#allocation2 + $0x28] sm:$0xf] %vm366_vm1, %v3358_v2  ;;  %378 = vst.msk [vmem:[#allocation2 + $0x2c] sm:$0xf] %vm366_vm1, %v3358_v2  ;;  %v772_v12 = vld [vmem:[%s4276_s5 + $0x1c] sm:$0xf]  ;;  %s3661_s18 = scalar_lea.vmem %s4271_s0, %s2960_s23  ;;  %3067 = vmatpush3.bf16.msra.mxu0 %v928_v11 }
  0x1c   : > { %379 = vst.msk [vmem:[#allocation2 + $0x30] sm:$0xf] %vm366_vm1, %v3358_v2  ;;  %380 = vst.msk [vmem:[#allocation2 + $0x34] sm:$0xf] %vm366_vm1, %v3358_v2  ;;  %v771_v13 = vld [vmem:[%s4276_s5 + $0x18] sm:$0xf] }
  0x1d   : > { %381 = vst.msk [vmem:[#allocation2 + $0x38] sm:$0xf] %vm366_vm1, %v3358_v2  ;;  %382 = vst.msk [vmem:[#allocation2 + $0x3c] sm:$0xf] %vm366_vm1, %v3358_v2  ;;  %850 = vperm.xlu1 %3265, %v770_v7   ;;  %838 = vperm.xlu0 %3264, %v769_v8   ;;  %v342_v14 = vld [vmem:[%s3661_s18 + $0xc0] sm:$0xff]  ;;  %v343_v15 = vld [vmem:[%s3661_s18 + $0xc8] sm:$0xff] }
  0x1e   : > { %383 = vst.msk [vmem:[#allocation2 + $0x40] sm:$0xf] %vm366_vm1, %v3358_v2  ;;  %384 = vst.msk [vmem:[#allocation2 + $0x44] sm:$0xf] %vm366_vm1, %v3358_v2  ;;  %v346_v16 = vld [vmem:[%s3661_s18 + $0xe0] sm:$0xff]  ;;  %v2970_v17 = vpack.c.bf16 %v342_v14, %v342_v14  ;;  %v3666_v18 = vpack.c.bf16 %v343_v15, %v343_v15  ;;  %v347_v19 = vld [vmem:[%s3661_s18 + $0xe8] sm:$0xff] }
  0x1f   : > { %385 = vst.msk [vmem:[#allocation2 + $0x48] sm:$0xf] %vm366_vm1, %v3358_v2  ;;  %386 = vst.msk [vmem:[#allocation2 + $0x4c] sm:$0xf] %vm366_vm1, %v3358_v2  ;;  %v2972_v20 = vpack.c.bf16 %v346_v16, %v346_v16  ;;  %v320_v21 = vld [vmem:[%s3661_s18 + $0x10] sm:$0xff]  ;;  %v2973_v23 = vpack.c.bf16 %v347_v19, %v347_v19  ;;  %v326_v35 = vld [vmem:[%s3661_s18 + $0x40] sm:$0xff] }
  0x20   : > { %387 = vst.msk [vmem:[#allocation2 + $0x50] sm:$0xf] %vm366_vm1, %v3358_v2  ;;  %388 = vst.msk [vmem:[#allocation2 + $0x54] sm:$0xf] %vm366_vm1, %v3358_v2  ;;  %v328_v22 = vld [vmem:[%s3661_s18 + $0x50] sm:$0xff]  ;;  %v2980_v26 = vpack.c.bf16 %v320_v21, %v320_v21  ;;  %v538_v31 = vrot.slane %v2970_v17, 6  ;;  %v2974_v41 = vpack.c.bf16 %v326_v35, %v326_v35 }
  0x21   : > { %389 = vst.msk [vmem:[#allocation2 + $0x58] sm:$0xf] %vm366_vm1, %v3358_v2  ;;  %390 = vst.msk [vmem:[#allocation2 + $0x5c] sm:$0xf] %vm366_vm1, %v3358_v2  ;;  %v344_v24 = vld [vmem:[%s3661_s18 + $0xd0] sm:$0xff]  ;;  %v2968_v25 = vpack.c.bf16 %v328_v22, %v328_v22  ;;  %v540_v32 = vrot.slane %v3666_v18, 6  ;;  %874 = vperm.xlu1 %3265, %v772_v12   ;;  %862 = vperm.xlu0 %3264, %v771_v13  }
  0x22   : > { %391 = vst.msk [vmem:[#allocation2 + $0x60] sm:$0xf] %vm366_vm1, %v3358_v2  ;;  %392 = vst.msk [vmem:[#allocation2 + $0x64] sm:$0xf] %vm366_vm1, %v3358_v2  ;;  %vm518_vm4 = vsmask.f32 7938  ;;  %v2964_v34 = vpack.c.bf16 %v344_v24, %v344_v24 }
  0x23   : > { %393 = vst.msk [vmem:[#allocation2 + $0x68] sm:$0xf] %vm366_vm1, %v3358_v2  ;;  %394 = vst.msk [vmem:[#allocation2 + $0x6c] sm:$0xf] %vm366_vm1, %v3358_v2  ;;  %v324_v27 = vld [vmem:[%s3661_s18 + $0x30] sm:$0xff]  ;;  %v552_v33 = vrot.slane %v2972_v20, 6 }
  0x24   : > { %395 = vst.msk [vmem:[#allocation2 + $0x70] sm:$0xf] %vm366_vm1, %v3358_v2  ;;  %396 = vst.msk [vmem:[#allocation2 + $0x74] sm:$0xf] %vm366_vm1, %v3358_v2  ;;  %v332_v28 = vld [vmem:[%s3661_s18 + $0x70] sm:$0xff]  ;;  %v4291_v36 = vmov 0  ;;  %v2978_v39 = vpack.c.bf16 %v324_v27, %v324_v27 }
  0x25   : > { %397 = vst.msk [vmem:[#allocation2 + $0x78] sm:$0xf] %vm366_vm1, %v3358_v2  ;;  %398 = vst.msk [vmem:[#allocation2 + $0x7c] sm:$0xf] %vm366_vm1, %v3358_v2  ;;  %v2127_v29 = vld [vmem:[%s4277_s6 + $0x4] sm:$0xf]  ;;  %v2966_v38 = vpack.c.bf16 %v332_v28, %v332_v28 }
  0x26   : > { %399 = vst.msk [vmem:[#allocation2 + $0x80] sm:$0xf] %vm366_vm1, %v3358_v2  ;;  %400 = vst.msk [vmem:[#allocation2 + $0x84] sm:$0xf] %vm366_vm1, %v3358_v2  ;;  %v2126_v30 = vld [vmem:[%s4277_s6] sm:$0xf]  ;;  %2151 = vperm.xlu1 %3265, %v2127_v29  }
  0x27   : > { %401 = vst.msk [vmem:[#allocation2 + $0x88] sm:$0xf] %vm366_vm1, %v3358_v2  ;;  %402 = vst.msk [vmem:[#allocation2 + $0x8c] sm:$0xf] %vm366_vm1, %v3358_v2  ;;  %vm496_vm5 = vsmask.f32 256  ;;  %2139 = vperm.xlu0 %3264, %v2126_v30  }
  0x28   : > { %403 = vst.msk [vmem:[#allocation2 + $0x90] sm:$0xf] %vm366_vm1, %v3358_v2  ;;  %404 = vst.msk [vmem:[#allocation2 + $0x94] sm:$0xf] %vm366_vm1, %v3358_v2  ;;  %vm497_vm6 = vsmask.f32 4368 }
  0x29   : > { %405 = vst.msk [vmem:[#allocation2 + $0x98] sm:$0xf] %vm366_vm1, %v3358_v2  ;;  %406 = vst.msk [vmem:[#allocation2 + $0x9c] sm:$0xf] %vm366_vm1, %v3358_v2  ;;  %v554_v37 = vrot.slane %v2973_v23, 6  ;;  %v327_v40 = vld [vmem:[%s3661_s18 + $0x48] sm:$0xff] }
  0x2a   : > { %407 = vst.msk [vmem:[#allocation2 + $0xa0] sm:$0xf] %vm366_vm1, %v3358_v2  ;;  %408 = vst.msk [vmem:[#allocation2 + $0xa4] sm:$0xf] %vm366_vm1, %v3358_v2  ;;  %v321_v42 = vld [vmem:[%s3661_s18 + $0x18] sm:$0xff]  ;;  %v539_v43 = vrot.slane %v538_v31, 4  ;;  %v2975_v46 = vpack.c.bf16 %v327_v40, %v327_v40 }
  0x2b   : > { %409 = vst.msk [vmem:[#allocation2 + $0xa8] sm:$0xf] %vm366_vm1, %v3358_v2  ;;  %410 = vst.msk [vmem:[#allocation2 + $0xac] sm:$0xf] %vm366_vm1, %v3358_v2  ;;  %v553_v44 = vrot.slane %v552_v33, 4  ;;  %v482_v45 = vrot.slane %v2964_v34, 6  ;;  %v2981_v0 = vpack.c.bf16 %v321_v42, %v321_v42 }
  0x2c   : > { %411 = vst.msk [vmem:[#allocation2 + $0xb0] sm:$0xf] %vm366_vm1, %v3358_v2  ;;  %412 = vst.msk [vmem:[#allocation2 + $0xb4] sm:$0xf] %vm366_vm1, %v3358_v2  ;;  %v329_v47 = vld [vmem:[%s3661_s18 + $0x58] sm:$0xff]  ;;  %vm913_vm8 = vcmask 31744  }
  0x2d   : > { %413 = vst.msk [vmem:[#allocation2 + $0xb8] sm:$0xf] %vm366_vm1, %v3358_v2  ;;  %414 = vst.msk [vmem:[#allocation2 + $0xbc] sm:$0xf] %vm366_vm1, %v3358_v2  ;;  %v345_v48 = vld [vmem:[%s3661_s18 + $0xd8] sm:$0xff]  ;;  %v500_v50 = vshrl.u32 %v2966_v38, 16  ;;  %v2969_v63 = vpack.c.bf16 %v329_v47, %v329_v47 }
  0x2e   : > { %415 = vst.msk [vmem:[#allocation2 + $0xc0] sm:$0xf] %vm366_vm1, %v3358_v2  ;;  %416 = vst.msk [vmem:[#allocation2 + $0xc4] sm:$0xf] %vm366_vm1, %v3358_v2  ;;  %v325_v49 = vld [vmem:[%s3661_s18 + $0x38] sm:$0xff]  ;;  %v503_v51 = vshll.u32 %v2966_v38, 16  ;;  %v2965_v58 = vpack.c.bf16 %v345_v48, %v345_v48 }
  0x2f   : > { %417 = vst.msk [vmem:[#allocation2 + $0xc8] sm:$0xf] %vm366_vm1, %v3358_v2  ;;  %418 = vst.msk [vmem:[#allocation2 + $0xcc] sm:$0xf] %vm366_vm1, %v3358_v2  ;;  %v601_v52 = vshrl.u32 %v2978_v39, 16  ;;  %v604_v53 = vshll.u32 %v2978_v39, 16  ;;  %v2979_v7 = vpack.c.bf16 %v325_v49, %v325_v49 }
  0x30   : > { %419 = vst.msk [vmem:[#allocation2 + $0xd0] sm:$0xf] %vm366_vm1, %v3358_v2  ;;  %420 = vst.msk [vmem:[#allocation2 + $0xd4] sm:$0xf] %vm366_vm1, %v3358_v2  ;;  %v333_v54 = vld [vmem:[%s3661_s18 + $0x78] sm:$0xff]  ;;  %v330_v55 = vld [vmem:[%s3661_s18 + $0x60] sm:$0xff] }
  0x31   : > { %421 = vst.msk [vmem:[#allocation2 + $0xd8] sm:$0xf] %vm366_vm1, %v3358_v2  ;;  %422 = vst.msk [vmem:[#allocation2 + $0xdc] sm:$0xf] %vm366_vm1, %v3358_v2  ;;  %v483_v59 = vrot.slane %v482_v45, 4  ;;  %v3725_v60 = vrot.slane %v500_v50, 7  ;;  %v2967_v6 = vpack.c.bf16 %v333_v54, %v333_v54  ;;  %v2976_v8 = vpack.c.bf16 %v330_v55, %v330_v55 }
  0x32   : > { %423 = vst.msk [vmem:[#allocation2 + $0xe0] sm:$0xf] %vm366_vm1, %v3358_v2  ;;  %424 = vst.msk [vmem:[#allocation2 + $0xe4] sm:$0xf] %vm366_vm1, %v3358_v2  ;;  %v3733_v62 = vrot.slane %v601_v52, 7  ;;  %v331_v1 = vld [vmem:[%s3661_s18 + $0x68] sm:$0xff] }
  0x33   : > { %425 = vst.msk [vmem:[#allocation2 + $0xe8] sm:$0xf] %vm366_vm1, %v3358_v2  ;;  %426 = vst.msk [vmem:[#allocation2 + $0xec] sm:$0xf] %vm366_vm1, %v3358_v2  ;;  %v619_v3 = vld [vmem:[#allocation2 + $0x60] sm:$0xf]  ;;  %v505_v11 = vor.u32 %v503_v51, %v3725_v60  ;;  %v2977_v21 = vpack.c.bf16 %v331_v1, %v331_v1 }
  0x34   : > { %427 = vst.msk [vmem:[#allocation2 + $0xf0] sm:$0xf] %vm366_vm1, %v3358_v2  ;;  %428 = vst.msk [vmem:[#allocation2 + $0xf4] sm:$0xf] %vm366_vm1, %v3358_v2  ;;  %v484_v5 = vrot.slane %v2965_v58, 6  ;;  %v340_v9 = vld [vmem:[%s3661_s18 + $0xb0] sm:$0xff]  ;;  %v606_v12 = vor.u32 %v604_v53, %v3733_v62 }
  0x35   : > { %429 = vst.msk [vmem:[#allocation2 + $0xf8] sm:$0xf] %vm366_vm1, %v3358_v2  ;;  %430 = vst.msk [vmem:[#allocation2 + $0xfc] sm:$0xf] %vm366_vm1, %v3358_v2  ;;  %v719_v4 = vld [vmem:[#allocation2 + $0xc0] sm:$0xf] }
  0x36   : > { %431 = vst.msk [vmem:[#allocation2 + $0x100] sm:$0xf] %vm366_vm1, %v3358_v2  ;;  %432 = vst.msk [vmem:[#allocation2 + $0x104] sm:$0xf] %vm366_vm1, %v3358_v2  ;;  %v506_v13 = vrot.slane %v3725_v60, 4  ;;  %v607_v14 = vrot.slane %v3733_v62, 4 }
  0x37   : > { %433 = vst.msk [vmem:[#allocation2 + $0x108] sm:$0xf] %vm366_vm1, %v3358_v2  ;;  %434 = vst.msk [vmem:[#allocation2 + $0x10c] sm:$0xf] %vm366_vm1, %v3358_v2  ;;  %v348_v15 = vld [vmem:[%s3661_s18 + $0xf0] sm:$0xff]  ;;  %v349_v16 = vld [vmem:[%s3661_s18 + $0xf8] sm:$0xff] }
  0x38   : > { %435 = vst.msk [vmem:[#allocation2 + $0x110] sm:$0xf] %vm366_vm1, %v3358_v2  ;;  %436 = vst.msk [vmem:[#allocation2 + $0x114] sm:$0xf] %vm366_vm1, %v3358_v2  ;;  %v508_v19 = vshrl.u32 %v2967_v6, 16  ;;  %v341_v22 = vld [vmem:[%s3661_s18 + $0xb8] sm:$0xff]  ;;  %v3775_v30 = vpack.c.bf16 %v348_v15, %v348_v15 }
  0x39   : > { %437 = vst.msk [vmem:[#allocation2 + $0x118] sm:$0xf] %vm366_vm1, %v3358_v2  ;;  %438 = vst.msk [vmem:[#allocation2 + $0x11c] sm:$0xf] %vm366_vm1, %v3358_v2  ;;  %v337_v24 = vld [vmem:[%s3661_s18 + $0x98] sm:$0xff]  ;;  %v609_v27 = vshrl.u32 %v2979_v7, 16 }
  0x3a   : > { %748 = vst.msk [vmem:[#allocation2 + $0xf0] sm:$0xf] %vm366_vm1, %v2970_v17  ;;  %749 = vst.msk [vmem:[#allocation2 + $0xf4] sm:$0xf] %vm366_vm1, %v3666_v18  ;;  %v3754_v17 = vld [vmem:[%s4272_s1 + $0x4] sm:$0x3]  ;;  %v2985_v40 = vpack.c.bf16 %v337_v24, %v337_v24 }
  0x3b   : > { %752 = vst.msk [vmem:[#allocation2 + $0xf8] sm:$0xf] %vm366_vm1, %v2972_v20  ;;  %vm3688_vm7 = vmor %vm479_vm0, %vm480_vm3  ;;  %v511_v20 = vshll.u32 %v2967_v6, 16  ;;  %3212 = vmatprep.subr.msk.bf16.mxu0 %vm479_vm0, %v3754_v17  ;;  %v612_v28 = vshll.u32 %v2979_v7, 16  ;;  %v510_v29 = vrot.slane %v508_v19, 7  ;;  %v4296_v35 = vmov 0 }
  0x3c   : > { %v4292_v36 = vsel %vm3688_vm7, 4294967295, %v4291_v36  ;;  %753 = vst.msk [vmem:[#allocation2 + $0xfc] sm:$0xf] %vm366_vm1, %v2973_v23  ;;  %630 = vst.msk [vmem:[#allocation2 + $0x68] sm:$0xf] %vm366_vm1, %v2980_v26  ;;  %v541_v56 = vsel %vm3688_vm7, %v539_v43, %v540_v32  ;;  %v555_v57 = vsel %vm3688_vm7, %v553_v44, %v554_v37  ;;  %v485_v18 = vsel %vm3688_vm7, %v483_v59, %v484_v5  ;;  %s2961_s17 = sshll.u32 %s3634_s13, 6 }
  0x3d   : > { %4293 = vst [vmem:[#allocation7_spill] sm:$0xff] %v4292_v36  ;;  %723 = vst.msk [vmem:[#allocation2 + $0xc8] sm:$0xf] %vm366_vm1, %v2968_v25  ;;  %v520_v23 = vld [vmem:[#allocation2 + $0x10] sm:$0xf]  ;;  %v2982_v32 = vpack.c.bf16 %v340_v9, %v340_v9  ;;  %v611_v37 = vrot.slane %v609_v27, 7  ;;  %v513_v42 = vor.u32 %v511_v20, %v510_v29  ;;  %s4093_s20 = scalar_lea.vmem %s4278_s7, %s2961_s17 }
  0x3e   : > { %531 = vst.msk [vmem:[#allocation2 + $0x18] sm:$0xf] %vm366_vm1, %v2968_v25  ;;  %589 = vst.msk [vmem:[#allocation2 + $0x50] sm:$0xf] %vm366_vm1, %v2968_v25  ;;  %vm444_vm11 = vsmask.f32 2304 }
  0x3f   : > { %706 = vst.msk [vmem:[#allocation2 + $0xa0] sm:$0xf] %vm366_vm1, %v2980_v26  ;;  %755 = vst.msk [vmem:[#allocation2 + $0x100] sm:$0xf] %vm366_vm1, %v2968_v25  ;;  %vm445_vm12 = vsmask.f32 6416 }
  0x40   : > { %545 = vst.msk [vmem:[#allocation2 + $0x20] sm:$0xc] %vm467_vm2, %v538_v31  ;;  %558 = vst.msk [vmem:[#allocation2 + $0x28] sm:$0xc] %vm467_vm2, %v552_v33  ;;  %v3777_v31 = vpack.c.bf16 %v349_v16, %v349_v16  ;;  %v336_v33 = vld [vmem:[%s3661_s18 + $0x90] sm:$0xff]  ;;  %v1290_v43 = vsel %vm479_vm0, %v3645_v10, 0 }
  0x41   : > { %739 = vst.msk [vmem:[#allocation2 + $0xd8] sm:$0xf] %vm366_vm1, %v2964_v34  ;;  %759 = vst.msk [vmem:[#allocation2 + $0x110] sm:$0xf] %vm366_vm1, %v2964_v34  ;;  %v2984_v44 = vpack.c.bf16 %v336_v33, %v336_v33  ;;  %v448_v47 = vshrl.u32 %v3775_v30, 16  ;;  %v638_v49 = vshrl.u32 %v2982_v32, 16 }
  0x42   : > { %593 = vst.msk [vmem:[#allocation2 + $0x58] sm:$0xf] %vm366_vm1, %v2966_v38  ;;  %710 = vst.msk [vmem:[#allocation2 + $0xa8] sm:$0xf] %vm366_vm1, %v2978_v39  ;;  %v457_v48 = vshrl.u32 %v3777_v31, 16  ;;  %v460_v10 = vshll.u32 %v3777_v31, 16 }
  0x43   : > { %757 = vst.msk [vmem:[#allocation2 + $0x108] sm:$0xf] %vm366_vm1, %v2966_v38  ;;  %567 = vst.msk [vmem:[#allocation2 + $0x30] sm:$0xf] %vm366_vm1, %v2974_v41  ;;  %v2983_v38 = vpack.c.bf16 %v341_v22, %v341_v22  ;;  %v640_v54 = vrot.slane %v638_v49, 7  ;;  %v725_v55 = vrot.slane %v448_v47, 7  ;;  %v796_v49 = vlaneseq }
  0x44   : > { %742 = vst.msk [vmem:[#allocation2 + $0xe0] sm:$0xf] %vm366_vm1, %v2974_v41  ;;  %568 = vst.msk [vmem:[#allocation2 + $0x34] sm:$0xf] %vm366_vm1, %v2975_v46  ;;  %v641_v59 = vshll.u32 %v2982_v32, 16  ;;  %v459_v9 = vrot.slane %v457_v48, 5 }
  0x45   : > { %489 = vst.msk [vmem:[#allocation2 + $0x8] sm:$0xc] %vm467_vm2, %v482_v45  ;;  %579 = vst.msk [vmem:[#allocation2 + $0x40] sm:$0xc] %vm467_vm2, %v482_v45  ;;  %v646_v51 = vshrl.u32 %v2983_v38, 16  ;;  %v649_v52 = vshll.u32 %v2983_v38, 16 }
  0x46   : > { %743 = vst.msk [vmem:[#allocation2 + $0xe4] sm:$0xf] %vm366_vm1, %v2975_v46  ;;  %546 = vst.msk [vmem:[#allocation2 + $0x24] sm:$0xf] %vm366_vm1, %v541_v56  ;;  %v614_v46 = vor.u32 %v612_v28, %v611_v37  ;;  %v728_v56 = vrot.slane %v457_v48, 7  ;;  %v581_v61 = vrot.slane %v3775_v30, 6 }
  0x47   : > { %559 = vst.msk [vmem:[#allocation2 + $0x2c] sm:$0xf] %vm366_vm1, %v555_v57  ;;  %vm3729_vm9 = vmand %vm366_vm1, %vm518_vm4  ;;  %v648_v57 = vrot.slane %v646_v51, 7  ;;  %vm468_vm13 = vsmask.f32 7946  ;;  %v319_v27 = vld [vmem:[%s3661_s18 + $0x8] sm:$0xff] }
  0x48   : > { %740 = vst.msk [vmem:[#allocation2 + $0xdc] sm:$0xf] %vm366_vm1, %v2965_v58  ;;  %760 = vst.msk [vmem:[#allocation2 + $0x114] sm:$0xf] %vm366_vm1, %v2965_v58  ;;  %v620_v25 = vsel %vm3729_vm9, %v606_v12, %v619_v3  ;;  %v720_v26 = vsel %vm3729_vm9, %v505_v11, %v719_v4  ;;  %v521_v39 = vsel %vm3729_vm9, %v505_v11, %v520_v23  ;;  %v451_v58 = vshll.u32 %v3775_v30, 16  ;;  %v322_v29 = vld [vmem:[%s3661_s18 + $0x20] sm:$0xff] }
  0x49   : > { %631 = vst.msk [vmem:[#allocation2 + $0x6c] sm:$0xf] %vm366_vm1, %v2981_v0  ;;  %724 = vst.msk [vmem:[#allocation2 + $0xcc] sm:$0xf] %vm366_vm1, %v2969_v63  ;;  %v729_v60 = vor.u32 %v728_v56, %v460_v10  ;;  %v655_v62 = vld [vmem:[#allocation2 + $0x70] sm:$0xf]  ;;  %v651_v1 = vor.u32 %v649_v52, %v648_v57  ;;  %v643_v4 = vor.u32 %v641_v59, %v640_v54 }
  0x4a   : > { %532 = vst.msk [vmem:[#allocation2 + $0x1c] sm:$0xf] %vm366_vm1, %v2969_v63  ;;  %590 = vst.msk [vmem:[#allocation2 + $0x54] sm:$0xf] %vm366_vm1, %v2969_v63  ;;  %v727_v3 = vrot.slane %v725_v55, 4  ;;  %v462_v11 = vrot.slane %v460_v10, 6  ;;  %v2987_v28 = vpack.c.bf16 %v319_v27, %v319_v27  ;;  %v2988_v37 = vpack.c.bf16 %v322_v29, %v322_v29 }
  0x4b   : > { %707 = vst.msk [vmem:[#allocation2 + $0xa4] sm:$0xf] %vm366_vm1, %v2981_v0  ;;  %756 = vst.msk [vmem:[#allocation2 + $0x104] sm:$0xf] %vm366_vm1, %v2969_v63  ;;  %v3268_v34 = vld [vmem:[#allocation2 + $0x30] sm:$0xff]   ;;  %v450_v63 = vrot.slane %v448_v47, 5 }
  0x4c   : > { %594 = vst.msk [vmem:[#allocation2 + $0x5c] sm:$0xf] %vm366_vm1, %v2967_v6  ;;  %711 = vst.msk [vmem:[#allocation2 + $0xac] sm:$0xf] %vm366_vm1, %v2979_v7  ;;  %v644_v0 = vrot.slane %v640_v54, 4  ;;  %v726_v7 = vor.u32 %v725_v55, %v451_v58  ;;  %v4301_v23 = vmov 0 }
  0x4d   : > { %758 = vst.msk [vmem:[#allocation2 + $0x10c] sm:$0xf] %vm366_vm1, %v2967_v6  ;;  %576 = vst.msk [vmem:[#allocation2 + $0x38] sm:$0xf] %vm366_vm1, %v2976_v8  ;;  %v3266_v41 = vld [vmem:[#allocation2 + $0x20] sm:$0xff]   ;;  %v582_v33 = vrot.slane %v581_v61, 4 }
  0x4e   : > { %744 = vst.msk [vmem:[#allocation2 + $0xe8] sm:$0xf] %vm366_vm1, %v2976_v8  ;;  %490 = vst.msk [vmem:[#allocation2 + $0xc] sm:$0xf] %vm366_vm1, %v485_v18  ;;  %v3267_v45 = vld [vmem:[#allocation2 + $0x28] sm:$0xff]   ;;  %3078 = vmatprep.mubr.msk.bf16.mxu1 %vm913_vm8, %v3266_v41  ;;  %v453_v8 = vrot.slane %v451_v58, 6 }
  0x4f   : > { %580 = vst.msk [vmem:[#allocation2 + $0x44] sm:$0xf] %vm366_vm1, %v485_v18  ;;  %621 = vst [vmem:[#allocation2 + $0x60] sm:$0xf] %v620_v25  ;;  %3079 = vmatmul.mubr.msk.bf16.vlgmr.msra.gmra.mxu1 %vm913_vm8, %v3267_v45  ;;  %v733_v5 = vld [vmem:[#allocation2 + $0xd0] sm:$0xf] }
  0x50   : > { %721 = vst [vmem:[#allocation2 + $0xc0] sm:$0xf] %v720_v26  ;;  %577 = vst.msk [vmem:[#allocation2 + $0x3c] sm:$0xf] %vm366_vm1, %v2977_v21  ;;  %3082 = vmatprep.mubr.msk.bf16.mxu1 %vm913_vm8, %v3268_v34  ;;  %3097 = vmatpush3.bf16.msra.mxu1 %v1290_v43  ;;  %v470_v16 = vld [vmem:[#allocation2] sm:$0xc]  ;;  %v734_v19 = vsel %vm3729_vm9, %v726_v7, %v733_v5  ;;  %v454_v20 = vor.u32 %v453_v8, %v450_v63 }
  0x51   : > { %745 = vst.msk [vmem:[#allocation2 + $0xec] sm:$0xf] %vm366_vm1, %v2977_v21  ;;  %vm3782_vm10 = vmor %vm496_vm5, %vm497_vm6  ;;  %v318_v18 = vld [vmem:[%s3661_s18] sm:$0xff]  ;;  %v463_v21 = vor.u32 %v462_v11, %v459_v9  ;;  %v583_v26 = vrot.slane %v3777_v31, 6  ;;  %v323_v34 = vld [vmem:[%s3661_s18 + $0x28] sm:$0xff]  ;;  %v797_v10 = vshrl.u32 %v796_v49, 7 }
  0x52   : > { %v4297_v35 = vsel %vm3782_vm10, 4294967295, %v4296_v35  ;;  %716 = vst.msk [vmem:[#allocation2 + $0xb8] sm:$0xf] %vm366_vm1, %v2982_v32  ;;  %763 = vst.msk [vmem:[#allocation2 + $0x118] sm:$0xf] %vm366_vm1, %v3775_v30  ;;  %v514_v50 = vsel %vm3782_vm10, %v506_v13, %v513_v42  ;;  %v615_v53 = vsel %vm3782_vm10, %v607_v14, %v614_v46  ;;  %v652_v12 = vsel %vm3782_vm10, %v644_v0, %v651_v1  ;;  %v335_v41 = vld [vmem:[%s3661_s18 + $0x88] sm:$0xff] }
  0x53   : > { %4298 = vst [vmem:[#allocation8_spill] sm:$0xff] %v4297_v35  ;;  %764 = vst.msk [vmem:[#allocation2 + $0x11c] sm:$0xf] %vm366_vm1, %v3777_v31  ;;  %v730_v13 = vsel %vm3782_vm10, %v727_v3, %v729_v60  ;;  %v656_v14 = vsel %vm3729_vm9, %v643_v4, %v655_v62  ;;  %v2986_v22 = vpack.c.bf16 %v318_v18, %v318_v18  ;;  %v455_v24 = vrot.slane %v454_v20, 4  ;;  %v3855_v30 = vld [vmem:[%s4272_s1 + $0xa] sm:$0x3] }
  0x54   : > { %522 = vst [vmem:[#allocation2 + $0x10] sm:$0xf] %v521_v39  ;;  %717 = vst.msk [vmem:[#allocation2 + $0xbc] sm:$0xf] %vm366_vm1, %v2983_v38  ;;  %v2989_v31 = vpack.c.bf16 %v323_v34, %v323_v34  ;;  %v584_v38 = vsel %vm3688_vm7, %v582_v33, %v583_v26  ;;  %3215 = vmatprep.subr.msk.bf16.mxu1 %vm479_vm0, %v3855_v30  ;;  %v334_v39 = vld [vmem:[%s3661_s18 + $0x80] sm:$0xff]  ;;  %v2991_v42 = vpack.c.bf16 %v335_v41, %v335_v41  ;;  %vm1963_vm3 = vcmask 64512  }
  0x55   : > { %667 = vst.msk [vmem:[#allocation2 + $0x7c] sm:$0xf] %vm366_vm1, %v2985_v40  ;;  %713 = vst.msk [vmem:[#allocation2 + $0xb4] sm:$0xf] %vm366_vm1, %v2985_v40  ;;  %v2990_v40 = vpack.c.bf16 %v334_v39, %v334_v39  ;;  %v338_v43 = vld [vmem:[%s3661_s18 + $0xa0] sm:$0xff]  ;;  %s304_s23 = sand.u32 1, %s3348_s28  }
  0x56   : > { %666 = vst.msk [vmem:[#allocation2 + $0x78] sm:$0xf] %vm366_vm1, %v2984_v44  ;;  %712 = vst.msk [vmem:[#allocation2 + $0xb0] sm:$0xf] %vm366_vm1, %v2984_v44  ;;  %v339_v44 = vld [vmem:[%s3661_s18 + $0xa8] sm:$0xff]  ;;  %v2992_v45 = vpack.c.bf16 %v338_v43, %v338_v43  ;;  %s2802_s24 = sshll.u32 %s304_s23, 4 }
  0x57   : > { %722 = vst.msk [vmem:[#allocation2 + $0xc4] sm:$0xf] %vm366_vm1, %v514_v50  ;;  %523 = vst.msk [vmem:[#allocation2 + $0x14] sm:$0xf] %vm366_vm1, %v514_v50  ;;  %v3269_v6 = vld [vmem:[#allocation2 + $0x38] sm:$0xff]   ;;  %v2993_v46 = vpack.c.bf16 %v339_v44, %v339_v44  ;;  %s306_s25 = scalar_lea.vmem [#allocation4], %s2802_s24 }
  0x58   : > { %622 = vst.msk [vmem:[#allocation2 + $0x64] sm:$0xf] %vm366_vm1, %v615_v53  ;;  %vm3824_vm14 = vmand %vm467_vm2, %vm468_vm13  ;;  %3083 = vmatmul.mubr.msk.bf16.gmra.mxu1 %vm913_vm8, %v3269_v6  ;;  %v3359_v47 = vmov 839922192   ;;  %v782_v55 = vld [vmem:[#allocation2 + $0x8] sm:$0xf] }
  0x59   : > { %658 = vst.msk [vmem:[#allocation2 + $0x74] sm:$0xf] %vm366_vm1, %v652_v12  ;;  %736 = vst.msk [vmem:[#allocation2 + $0xd4] sm:$0xf] %vm366_vm1, %v730_v13  ;;  %v471_v25 = vsel %vm3824_vm14, %v454_v20, %v470_v16  ;;  %v794_v48 = vunpack.c.l.s4 %v3359_v47  ;;  %v1242_v57 = vld [vmem:[#allocation2 + $0x6c] sm:$0xf] }
  0x5a   : > { %657 = vst [vmem:[#allocation2 + $0x70] sm:$0xf] %v656_v14  ;;  %735 = vst [vmem:[#allocation2 + $0xd0] sm:$0xf] %v734_v19  ;;  %v1239_v58 = vld [vmem:[#allocation2 + $0x60] sm:$0xf] }
  0x5b   : > { %vm3835_vm15 = vmor %vm444_vm11, %vm445_vm12  ;;  %676 = vst.msk [vmem:[#allocation2 + $0x80] sm:$0xf] %vm366_vm1, %v2986_v22  ;;  %v795_v50 = vunpack.c.0.s8 %v794_v48  ;;  %v783_v60 = vld [vmem:[#allocation2 + $0xc] sm:$0xf]  ;;  %v1241_v0 = vld [vmem:[#allocation2 + $0x68] sm:$0xf] }
  0x5c   : > { %v4302_v23 = vsel %vm3835_vm15, 4294967295, %v4301_v23  ;;  %472 = vst [vmem:[#allocation2] sm:$0xc] %v471_v25  ;;  %v464_v32 = vsel %vm3835_vm15, %v455_v24, %v463_v21  ;;  %587 = vst.msk [vmem:[#allocation2 + $0x48] sm:$0xc] %vm467_vm2, %v581_v61  ;;  %vm3361_vm2 = vmmov 0  }
  0x5d   : > { %4303 = vst [vmem:[#allocation9_spill] sm:$0xff] %v4302_v23  ;;  %473 = vst.msk [vmem:[#allocation2 + $0x4] sm:$0xf] %vm366_vm1, %v464_v32  ;;  %v3873_v51 = vsub.s32 %v795_v50, %v797_v10  ;;  %v784_v22 = vld [vmem:[#allocation2 + $0x10] sm:$0xf]  ;;  %s2711_s26 = sshll.u32 %s306_s25, 4  ;;  %s4228_s26 = int_to_ptr.vmem [resolvable:$true] %s2711_s26 }
  0x5e   : > { %677 = vst.msk [vmem:[#allocation2 + $0x84] sm:$0xf] %vm366_vm1, %v2987_v28  ;;  %685 = vst.msk [vmem:[#allocation2 + $0x88] sm:$0xf] %vm366_vm1, %v2988_v37  ;;  %v785_v20 = vld [vmem:[#allocation2 + $0x14] sm:$0xf] }
  0x5f   : > { %588 = vst.msk [vmem:[#allocation2 + $0x4c] sm:$0xf] %vm366_vm1, %v584_v38  ;;  %686 = vst.msk [vmem:[#allocation2 + $0x8c] sm:$0xf] %vm366_vm1, %v2989_v31  ;;  %v1240_v63 = vld [vmem:[#allocation2 + $0x64] sm:$0xf] }
  0x60   : > { %694 = vst.msk [vmem:[#allocation2 + $0x90] sm:$0xf] %vm366_vm1, %v2990_v40  ;;  %695 = vst.msk [vmem:[#allocation2 + $0x94] sm:$0xf] %vm366_vm1, %v2991_v42  ;;  %v1244_v21 = vld [vmem:[#allocation2 + $0x74] sm:$0xf] }
  0x61   : > { %703 = vst.msk [vmem:[#allocation2 + $0x98] sm:$0xf] %vm366_vm1, %v2992_v45  ;;  %704 = vst.msk [vmem:[#allocation2 + $0x9c] sm:$0xf] %vm366_vm1, %v2993_v46  ;;  %v1243_v26 = vld [vmem:[#allocation2 + $0x70] sm:$0xf] }
  0x62   : > { %4304 = vst [vmem:[#allocation10_spill] sm:$0xff] %v3873_v51  ;;  %v1164_v28 = vsel %vm479_vm0, %v3754_v17, 0  ;;  %v787_v37 = vld [vmem:[#allocation2 + $0x1c] sm:$0xf]  ;;  %v2875_v39 = vld [vmem:[%s4272_s1 + $0x8] sm:$0x3] }
  0x63   : > { %v780_v4 = vld [vmem:[#allocation2] sm:$0xf]  ;;  %v1246_v31 = vld [vmem:[#allocation2 + $0x7c] sm:$0xf]  ;;  %v786_v41 = vld [vmem:[#allocation2 + $0x18] sm:$0xf] }
  0x64   : > { %v781_v5 = vld [vmem:[#allocation2 + $0x4] sm:$0xf]  ;;  %v1245_v43 = vld [vmem:[#allocation2 + $0x78] sm:$0xf]  ;;  %v1526_v45 = vsel %vm479_vm0, %v3855_v30, 0  ;;  %vm2172_vm1 = vcmask 1043456  }
  0x65   : > { %v2902_v49 = vld [vmem:[%s4272_s1 + $0xe] sm:$0x3]  ;;  %s3002_s10 = sshll.u32 %s3431_s9, 8  ;;  %s4231_s19 = scalar_lea.sflag [#allocation5], %s304_s23 }
  0x66   : > { %s4226_s18 = scalar_lea.hbm %s4279_s8, %s3002_s10  ;;  %s3296_s9 = scalar_lea.vmem %s4228_s26, 256 }
  0x67   : > { %p3297_p11 = scmp.ne.s32.totalorder %s4228_s26, %s3296_s9 }
  0x69   : > { %p3298_p12 = pnand %p3297_p11, %p3448_p5 }
  0x6b   : > { %p3299_p13 = pneg %p3298_p12 }
  0x90   : > { %v815_v52 = vpop.permute.xlu1 %814  ;;  %v791_v53 = vpop.permute.xlu0 %790 }
  0x91   : > { %v3876_v54 = vrot.slane %v815_v52, %v3873_v51  ;;  %v3879_v56 = vrot.slane %v791_v53, %v3873_v51  ;;  %v3270_v53 = vld [vmem:[#allocation2 + $0x40] sm:$0xff]  }
  0x93   : > { %v886_v6 = vmul.bf16 %v3876_v54, %v782_v55  ;;  %v1247_v7 = vmul.bf16 %v1239_v58, %v3879_v56  ;;  %v1249_v12 = vmul.bf16 %v1241_v0, %v3876_v54  ;;  %v884_v15 = vmul.bf16 %v3879_v56, %v780_v4  ;;  %v3276_v55 = vld [vmem:[#allocation2 + $0xa0] sm:$0xff]   ;;  %v3272_v58 = vld [vmem:[#allocation2 + $0x50] sm:$0xff]   ;;  %v3273_v4 = vld [vmem:[#allocation2 + $0x58] sm:$0xff]  }
  0x94   : > { %v827_v59 = vpop.permute.xlu1 %826  ;;  %v803_v62 = vpop.permute.xlu0 %802  ;;  %v1770_v0 = vsel %vm479_vm0, %v2902_v49, 0 }
  0x95   : > { %v3882_v1 = vrot.slane %v827_v59, %v3873_v51  ;;  %v3885_v3 = vrot.slane %v803_v62, %v3873_v51  ;;  %v1408_v59 = vsel %vm479_vm0, %v2875_v39, 0  ;;  %v2893_v62 = vld [vmem:[%s4272_s1 + $0xc] sm:$0x3] }
  0x97   : > { %v887_v8 = vmul.bf16 %v3882_v1, %v783_v60  ;;  %v1250_v9 = vmul.bf16 %v1242_v57, %v3882_v1  ;;  %v1248_v11 = vmul.bf16 %v1240_v63, %v3885_v3  ;;  %v885_v16 = vmul.bf16 %v3885_v3, %v781_v5  ;;  %v3271_v57 = vld [vmem:[#allocation2 + $0x48] sm:$0xff]   ;;  %v3280_v63 = vld [vmem:[#allocation2 + $0xb0] sm:$0xff]   ;;  %v3274_v5 = vld [vmem:[#allocation2 + $0x80] sm:$0xff]  }
  0x98   : > { %v851_v13 = vpop.permute.xlu1 %850  ;;  %v839_v14 = vpop.permute.xlu0 %838  ;;  %v3277_v60 = vld [vmem:[#allocation2 + $0xa8] sm:$0xff]  }
  0x99   : > { %v2841_v18 = vcombine.low %v886_v6, %v887_v8  ;;  %v2867_v19 = vcombine.low %v1247_v7, %v1248_v11  ;;  %v2868_v24 = vcombine.low %v1249_v12, %v1250_v9  ;;  %v3896_v25 = vrot.slane %v851_v13, %v3873_v51  ;;  %v3281_v6 = vld [vmem:[#allocation2 + $0xb8] sm:$0xff]   ;;  %v3282_v7 = vld [vmem:[#allocation2 + $0xe0] sm:$0xff]   ;;  %v3275_v8 = vld [vmem:[#allocation2 + $0x88] sm:$0xff]  }
  0x9a   : > { %v3899_v61 = vrot.slane %v839_v14, %v3873_v51  ;;  %v2840_v27 = vcombine.low %v884_v15, %v885_v16  ;;  %v3278_v9 = vld [vmem:[#allocation2 + $0x90] sm:$0xff]   ;;  %v1652_v11 = vsel %vm479_vm0, %v2893_v62, 0  ;;  %v3283_v12 = vld [vmem:[#allocation2 + $0xe8] sm:$0xff]   ;;  %v1602_v15 = vld [vmem:[#allocation2 + $0xc4] sm:$0xf] }
  0x9b   : > { %3098 = vmatprep.mubr.msk.bf16.mxu1 %vm913_vm8, %v2867_v19  ;;  %v889_v29 = vmul.bf16 %v3896_v25, %v785_v20  ;;  %v1252_v32 = vmul.bf16 %v1244_v21, %v3896_v25  ;;  %v2911_v13 = vld [vmem:[%s4272_s1 + $0x10] sm:$0x3]  ;;  %v1601_v16 = vld [vmem:[#allocation2 + $0xc0] sm:$0xf]  ;;  %v3279_v19 = vld [vmem:[#allocation2 + $0x98] sm:$0xff]  }
  0x9c   : > { %v888_v33 = vmul.bf16 %v3899_v61, %v784_v22  ;;  %3068 = vmatprep.mubr.msk.bf16.mxu0 %vm913_vm8, %v2840_v27  ;;  %v875_v34 = vpop.permute.xlu1 %874  ;;  %v863_v38 = vpop.permute.xlu0 %862  ;;  %v1251_v40 = vmul.bf16 %v1243_v26, %v3899_v61  ;;  %3099 = vmatmul.mubr.msk.bf16.vlgmr.msra.gmra.mxu1 %vm913_vm8, %v2868_v24  ;;  %v3284_v14 = vld [vmem:[#allocation2 + $0xf0] sm:$0xff]   ;;  %v1609_v20 = vmul.bf16 %v1601_v16, %v3879_v56  ;;  %v3285_v21 = vld [vmem:[#allocation2 + $0xf8] sm:$0xff]   ;;  %v1604_v22 = vld [vmem:[#allocation2 + $0xcc] sm:$0xf] }
  0x9d   : > { %v3913_v17 = vrot.slane %v875_v34, %v3873_v51  ;;  %v3916_v42 = vrot.slane %v863_v38, %v3873_v51  ;;  %3069 = vmatmul.mubr.msk.bf16.vlgmr.msra.gmra.mxu0 %vm913_vm8, %v2841_v18  ;;  %3117 = vmatpush3.bf16.msra.mxu1 %v1526_v45  ;;  %v1610_v18 = vmul.bf16 %v1602_v15, %v3885_v3  ;;  %v1606_v26 = vld [vmem:[#allocation2 + $0xd4] sm:$0xf]  ;;  %v1605_v27 = vld [vmem:[#allocation2 + $0xd0] sm:$0xf]  ;;  %v1888_v34 = vsel %vm479_vm0, %v2911_v13, 0 }
  0x9e   : > { %v2842_v44 = vcombine.low %v888_v33, %v889_v29  ;;  %3087 = vmatpush3.bf16.msra.mxu0 %v1164_v28  ;;  %v2869_v46 = vcombine.low %v1251_v40, %v1252_v32  ;;  %3217 = vmatprep.subr.msk.bf16.mxu1 %vm479_vm0, %v2902_v49  ;;  %v1603_v28 = vld [vmem:[#allocation2 + $0xc8] sm:$0xf]  ;;  %v1612_v29 = vmul.bf16 %v1604_v22, %v3882_v1  ;;  %v1607_v38 = vld [vmem:[#allocation2 + $0xd8] sm:$0xf] }
  0x9f   : > { %v891_v47 = vmul.bf16 %v3913_v17, %v787_v37  ;;  %v1254_v48 = vmul.bf16 %v1246_v31, %v3913_v17  ;;  %3214 = vmatprep.subr.msk.bf16.mxu0 %vm479_vm0, %v2875_v39  ;;  %v890_v50 = vmul.bf16 %v3916_v42, %v786_v41  ;;  %v1253_v10 = vmul.bf16 %v1245_v43, %v3916_v42  ;;  %v1608_v31 = vld [vmem:[#allocation2 + $0xdc] sm:$0xf] }
  0xa0   : > { %3072 = vmatprep.mubr.msk.bf16.mxu0 %vm913_vm8, %v2842_v44  ;;  %3102 = vmatprep.mubr.msk.bf16.mxu1 %vm913_vm8, %v2869_v46  ;;  %v2894_v24 = vcombine.low %v1609_v20, %v1610_v18  ;;  %v1614_v3 = vmul.bf16 %v1606_v26, %v3896_v25  ;;  %v1613_v32 = vmul.bf16 %v1605_v27, %v3899_v61  ;;  %v3286_v25 = vld [vmem:[#allocation2 + $0x100] sm:$0xff]   ;;  %v3288_v61 = vld [vmem:[#allocation2 + $0x110] sm:$0xff]   ;;  %v3289_v41 = vld [vmem:[#allocation2 + $0x118] sm:$0xff]   ;;  %v4280_v43 = vmov 0.0  }
  0xa1   : > { %v2843_v30 = vcombine.low %v890_v50, %v891_v47  ;;  %v2870_v52 = vcombine.low %v1253_v10, %v1254_v48  ;;  %v1611_v56 = vmul.bf16 %v1603_v28, %v3876_v54  ;;  %v1616_v1 = vmul.bf16 %v1608_v31, %v3913_v17  ;;  %v3287_v54 = vld [vmem:[#allocation2 + $0x108] sm:$0xff]   ;;  %v2163_v17 = vld [vmem:[%s4274_s3] sm:$0xf] }
  0xa2   : > { %v2896_v37 = vcombine.low %v1613_v32, %v1614_v3  ;;  %v1615_v39 = vmul.bf16 %v1607_v38, %v3916_v42  ;;  %v2934_v42 = vld [vmem:[%s4274_s3 + $0x8] sm:$0xf]  ;;  %v2174_v44 = vsel %vm2172_vm1, %v2163_v17, 0 }
  0xa3   : > { %v2895_v33 = vcombine.low %v1611_v56, %v1612_v29  ;;  %v2290_v45 = vsel %vm2172_vm1, %v2934_v42, 0  ;;  %v2839_v56 = vld [vmem:[%s4273_s2] ss:$0 sm:$0xff] }
  0xa4   : > { %3103 = vmatmul.mubr.msk.bf16.gmra.mxu1 %vm913_vm8, %v2870_v52  ;;  %v2897_v40 = vcombine.low %v1615_v39, %v1616_v1 }
  0xa5   : > { %3073 = vmatmul.mubr.msk.bf16.gmra.mxu0 %vm913_vm8, %v2843_v30  ;;  %3118 = vmatprep.mubr.msk.bf16.mxu1 %vm913_vm8, %v3276_v55 }
  0xa6   : > { %3088 = vmatprep.mubr.msk.bf16.mxu0 %vm913_vm8, %v3270_v53 }
  0xac   : > { %3119 = vmatmul.mubr.msk.bf16.vlgmr.msra.gmra.mxu1 %vm913_vm8, %v3277_v60 }
  0xad   : > { %3089 = vmatmul.mubr.msk.bf16.vlgmr.msra.gmra.mxu0 %vm913_vm8, %v3271_v57  ;;  %3122 = vmatprep.mubr.msk.bf16.mxu1 %vm913_vm8, %v3280_v63 }
  0xae   : > { %3107 = vmatpush3.bf16.msra.mxu0 %v1408_v59  ;;  %3092 = vmatprep.mubr.msk.bf16.mxu0 %vm913_vm8, %v3272_v58 }
  0xaf   : > { %3216 = vmatprep.subr.msk.bf16.mxu0 %vm479_vm0, %v2893_v62  ;;  %3137 = vmatpush3.bf16.msra.mxu1 %v1770_v0 }
  0xb0   : > { %3156 = vmatprep.subr.bf16.mxu1 %v4280_v43 }
  0xb4   : > { %3123 = vmatmul.mubr.msk.bf16.gmra.mxu1 %vm913_vm8, %v3281_v6 }
  0xb5   : > { %3093 = vmatmul.mubr.msk.bf16.gmra.mxu0 %vm913_vm8, %v3273_v4  ;;  %3138 = vmatprep.mubr.msk.bf16.mxu1 %vm913_vm8, %v3282_v7 }
  0xb6   : > { %3108 = vmatprep.mubr.msk.bf16.mxu0 %vm913_vm8, %v3274_v5 }
  0xbc   : > { %3139 = vmatmul.mubr.msk.bf16.vlgmr.msra.gmra.mxu1 %vm913_vm8, %v3283_v12 }
  0xbd   : > { %3109 = vmatmul.mubr.msk.bf16.vlgmr.msra.gmra.mxu0 %vm913_vm8, %v3275_v8  ;;  %3142 = vmatprep.mubr.msk.bf16.mxu1 %vm913_vm8, %v3284_v14 }
  0xbe   : > { %3127 = vmatpush3.bf16.msra.mxu0 %v1652_v11  ;;  %3112 = vmatprep.mubr.msk.bf16.mxu0 %vm913_vm8, %v3278_v9 }
  0xbf   : > { %3218 = vmatprep.subr.msk.bf16.mxu0 %vm479_vm0, %v2911_v13  ;;  %vm1984_vm0 = vcmask 60416   ;;  %3157 = vmatpush3.bf16.msra.mxu1 %v2174_v44 }
  0xc0   : > { %1991 = vst.msk [vmem:[#allocation3 + $0x18] sm:$0xf] %vm1984_vm0, %v3358_v2  ;;  %1995 = vst.msk [vmem:[#allocation3 + $0x28] sm:$0xf] %vm1984_vm0, %v3358_v2  ;;  %3162 = vmatprep.subr.bf16.mxu1 %v4280_v43 }
  0xc1   : > { %1985 = vst.msk [vmem:[#allocation3] sm:$0xf] %vm1984_vm0, %v3358_v2  ;;  %1986 = vst.msk [vmem:[#allocation3 + $0x4] sm:$0xf] %vm1984_vm0, %v3358_v2 }
  0xc2   : > { %1987 = vst.msk [vmem:[#allocation3 + $0x8] sm:$0xf] %vm1984_vm0, %v3358_v2  ;;  %1988 = vst.msk [vmem:[#allocation3 + $0xc] sm:$0xf] %vm1984_vm0, %v3358_v2 }
  0xc3   : > { %1989 = vst.msk [vmem:[#allocation3 + $0x10] sm:$0xf] %vm1984_vm0, %v3358_v2  ;;  %1990 = vst.msk [vmem:[#allocation3 + $0x14] sm:$0xf] %vm1984_vm0, %v3358_v2 }
  0xc4   : > { %3143 = vmatmul.mubr.msk.bf16.gmra.mxu1 %vm913_vm8, %v3285_v21  ;;  %1992 = vst.msk [vmem:[#allocation3 + $0x1c] sm:$0xf] %vm1984_vm0, %v3358_v2  ;;  %1993 = vst.msk [vmem:[#allocation3 + $0x20] sm:$0xf] %vm1984_vm0, %v3358_v2 }
  0xc5   : > { %3113 = vmatmul.mubr.msk.bf16.gmra.mxu0 %vm913_vm8, %v3279_v19  ;;  %1994 = vst.msk [vmem:[#allocation3 + $0x24] sm:$0xf] %vm1984_vm0, %v3358_v2  ;;  %1996 = vst.msk [vmem:[#allocation3 + $0x2c] sm:$0xf] %vm1984_vm0, %v3358_v2  ;;  %3158 = vmatprep.mubr.msk.bf16.mxu1 %vm3361_vm2, %v4280_v43 }
  0xc6   : > { %3128 = vmatprep.mubr.msk.bf16.mxu0 %vm913_vm8, %v2894_v24  ;;  %1997 = vst.msk [vmem:[#allocation3 + $0x30] sm:$0xf] %vm1984_vm0, %v3358_v2  ;;  %1998 = vst.msk [vmem:[#allocation3 + $0x34] sm:$0xf] %vm1984_vm0, %v3358_v2 }
  0xc7   : > { %1999 = vst.msk [vmem:[#allocation3 + $0x38] sm:$0xf] %vm1984_vm0, %v3358_v2  ;;  %2000 = vst.msk [vmem:[#allocation3 + $0x3c] sm:$0xf] %vm1984_vm0, %v3358_v2 }
  0xc8   : > { %2001 = vst.msk [vmem:[#allocation3 + $0x40] sm:$0xf] %vm1984_vm0, %v3358_v2  ;;  %2002 = vst.msk [vmem:[#allocation3 + $0x44] sm:$0xf] %vm1984_vm0, %v3358_v2 }
  0xc9   : > { %vm4110_vm5 = vmand %vm1984_vm0, %vm518_vm4  ;;  %vm2028_vm4 = vcmask 60418  }
  0xca   : > { %vm4136_vm6 = vmand %vm2028_vm4, %vm468_vm13 }
  0xcd   : > { %3129 = vmatmul.mubr.msk.bf16.vlgmr.msra.gmra.mxu0 %vm913_vm8, %v2895_v33 }
  0xce   : > { %3147 = vmatpush3.bf16.msra.mxu0 %v1888_v34  ;;  %3132 = vmatprep.mubr.msk.bf16.mxu0 %vm913_vm8, %v2896_v37 }
  0xcf   : > { %3168 = vmatprep.subr.bf16.mxu0 %v4280_v43 }
  0xd5   : > { %3133 = vmatmul.mubr.msk.bf16.gmra.mxu0 %vm913_vm8, %v2897_v40 }
  0xd6   : > { %3148 = vmatprep.mubr.msk.bf16.mxu0 %vm913_vm8, %v3286_v25 }
  0xdd   : > { %3149 = vmatmul.mubr.msk.bf16.vlgmr.msra.gmra.mxu0 %vm913_vm8, %v3287_v54 }
  0xde   : > { %3152 = vmatprep.mubr.msk.bf16.mxu0 %vm913_vm8, %v3288_v61  ;;  %3169 = vmatpush3.bf16.msra.mxu0 %v2290_v45 }
  0xdf   : > { %3180 = vmatprep.subr.bf16.mxu0 %v4280_v43 }
  0xe5   : > { %3153 = vmatmul.mubr.msk.bf16.gmra.mxu0 %vm913_vm8, %v3289_v41 }
  0xe6   : > { %3170 = vmatprep.mubr.msk.bf16.mxu0 %vm3361_vm2, %v4280_v43 }
 0x10f   : > { %v3080_v2 = vpop.f32.mrf.mxu1 }
 0x111   : > { %v1082_v46 = vpop.f32.mrf.mxu1 }
 0x113   : > { %v3081_v47 = vpop.f32.mrf.mxu1 }
 0x115   : > { %v4031_v48 = vpop.f32.mrf.mxu1 }
 0x118   : > { %v4033_v49 = vpop.f32.mrf.mxu1 }
 0x11a   : > { %v4035_v50 = vpop.f32.mrf.mxu1 }
 0x11c   : > { %v4037_v10 = vpop.f32.mrf.mxu1 }
 0x11e   : > { %v4039_v30 = vpop.f32.mrf.mxu1 }
 0x15c   : > { %v3100_v53 = vpop.f32.mrf.mxu1 }
 0x15d   : > { %v3070_v52 = vpop.f32.mrf.mxu0 }
 0x15e   : > { %v1326_v57 = vpop.f32.mrf.mxu1  ;;  %v997_v37 = vadd.f32 %v3070_v52, %v2839_v56 }
 0x15f   : > { %v964_v55 = vpop.f32.mrf.mxu0 }
 0x160   : > { %v4041_v59 = vpop.f32.mrf.mxu1  ;;  %v995_v1 = vadd.f32 %v2839_v56, %v964_v55  ;;  %v1115_v40 = vadd.f32 %v3080_v2, %v997_v37 }
 0x161   : > { %v3071_v58 = vpop.f32.mrf.mxu0 }
 0x162   : > { %v4043_v62 = vpop.f32.mrf.mxu1  ;;  %v998_v25 = vadd.f32 %v3071_v58, %v2839_v56  ;;  %v1113_v17 = vadd.f32 %v1082_v46, %v995_v1 }
 0x163   : > { %v967_v60 = vpop.f32.mrf.mxu0 }
 0x164   : > { %v4045_v0 = vpop.f32.mrf.mxu1  ;;  %v996_v42 = vadd.f32 %v2839_v56, %v967_v60  ;;  %v1116_v51 = vadd.f32 %v3081_v47, %v998_v25 }
 0x165   : > { %v3074_v63 = vpop.f32.mrf.mxu0 }
 0x166   : > { %v4047_v5 = vpop.f32.mrf.mxu1  ;;  %v1001_v44 = vadd.f32 %v3074_v63, %v2839_v56  ;;  %v1114_v55 = vadd.f32 %v4031_v48, %v996_v42 }
 0x167   : > { %v980_v4 = vpop.f32.mrf.mxu0 }
 0x168   : > { %v4049_v7 = vpop.f32.mrf.mxu1  ;;  %v1119_v58 = vadd.f32 %v4033_v49, %v1001_v44 }
 0x169   : > { %v3075_v6 = vpop.f32.mrf.mxu0 }
 0x16a   : > { %v4051_v9 = vpop.f32.mrf.mxu1  ;;  %v1002_v37 = vadd.f32 %v3075_v6, %v2839_v56 }
 0x16b   : > { %v983_v8 = vpop.f32.mrf.mxu0 }
 0x16c   : > { %v3120_v13 = vpop.f32.mrf.mxu1  ;;  %v1000_v46 = vadd.f32 %v2839_v56, %v983_v8 }
 0x16d   : > { %v3090_v11 = vpop.f32.mrf.mxu0 }
 0x16e   : > { %v4053_v15 = vpop.f32.mrf.mxu1  ;;  %v1233_v41 = vadd.f32 %v3090_v11, %v1115_v40 }
 0x16f   : > { %v1200_v12 = vpop.f32.mrf.mxu0 }
 0x170   : > { %v4055_v18 = vpop.f32.mrf.mxu1  ;;  %v1231_v43 = vadd.f32 %v1200_v12, %v1113_v17  ;;  %v1359_v35 = vadd.f32 %v3100_v53, %v1233_v41 }
 0x171   : > { %v3091_v14 = vpop.f32.mrf.mxu0 }
 0x172   : > { %v4057_v20 = vpop.f32.mrf.mxu1  ;;  %v1234_v36 = vadd.f32 %v3091_v14, %v1116_v51 }
 0x173   : > { %v1203_v16 = vpop.f32.mrf.mxu0 }
 0x174   : > { %v4059_v24 = vpop.f32.mrf.mxu1  ;;  %v1232_v60 = vadd.f32 %v1203_v16, %v1114_v55  ;;  %v1360_v47 = vadd.f32 %v4041_v59, %v1234_v36 }
 0x175   : > { %v3094_v19 = vpop.f32.mrf.mxu0 }
 0x176   : > { %v4061_v28 = vpop.f32.mrf.mxu1  ;;  %v1237_v63 = vadd.f32 %v3094_v19, %v1119_v58 }
 0x177   : > { %v1216_v21 = vpop.f32.mrf.mxu0  ;;  %4305 = vst [vmem:[#allocation11_spill] sm:$0xff] %v4061_v28  ;;  %v1357_v28 = vadd.f32 %v1326_v57, %v1231_v43  ;;  %v1358_v43 = vadd.f32 %v4043_v62, %v1232_v60 }
 0x178   : > { %v4063_v32 = vpop.f32.mrf.mxu1  ;;  %v1363_v57 = vadd.f32 %v4045_v0, %v1237_v63 }
 0x179   : > { %v3095_v22 = vpop.f32.mrf.mxu0  ;;  %4306 = vst [vmem:[#allocation12_spill] sm:$0xff] %v4063_v32 }
 0x17a   : > { %v4068_v31 = vpop.f32.mrf.mxu1 }
 0x17b   : > { %v1219_v26 = vpop.f32.mrf.mxu0  ;;  %4307 = vst [vmem:[#allocation13_spill] sm:$0xff] %v4068_v31  ;;  %v999_v31 = vadd.f32 %v2839_v56, %v980_v4  ;;  %v1120_v4 = vadd.f32 %v4037_v10, %v1002_v37 }
 0x17c   : > { %v3140_v54 = vpop.f32.mrf.mxu1 }
 0x17d   : > { %v3110_v27 = vpop.f32.mrf.mxu0  ;;  %v1117_v51 = vadd.f32 %v4035_v50, %v999_v31  ;;  %v1238_v16 = vadd.f32 %v3095_v22, %v1120_v4 }
 0x17e   : > { %v1806_v23 = vpop.f32.mrf.mxu1  ;;  %v1477_v32 = vadd.f32 %v3110_v27, %v1359_v35  ;;  %v1118_v35 = vadd.f32 %v4039_v30, %v1000_v46  ;;  %v4308_v40 = vld [vmem:[#allocation11_spill] sm:$0xff] }
 0x17f   : > { %v1444_v29 = vpop.f32.mrf.mxu0  ;;  %v1235_v6 = vadd.f32 %v1216_v21, %v1117_v51  ;;  %v1364_v62 = vadd.f32 %v4049_v7, %v1238_v16 }
 0x180   : > { %v3141_v11 = vpop.f32.mrf.mxu1  ;;  %v1475_v12 = vadd.f32 %v1444_v29, %v1357_v28  ;;  %v1595_v48 = vadd.f32 %v3120_v13, %v1477_v32  ;;  %v1236_v50 = vadd.f32 %v1219_v26, %v1118_v35  ;;  %v4309_v17 = vld [vmem:[#allocation12_spill] sm:$0xff]  ;;  %v2084_v35 = vld [vmem:[#allocation3 + $0x18] sm:$0xf] }
 0x181   : > { %v3111_v3 = vpop.f32.mrf.mxu0  ;;  %v1361_v30 = vadd.f32 %v4047_v5, %v1235_v6  ;;  %v2140_v6 = vpop.permute.xlu0 %2139 }
 0x182   : > { %v1478_v14 = vadd.f32 %v3111_v3, %v1360_v47  ;;  %v1809_v49 = vpop.f32.mrf.mxu1  ;;  %v1593_v36 = vadd.f32 %v4053_v15, %v1475_v12  ;;  %v1362_v32 = vadd.f32 %v4051_v9, %v1236_v50 }
 0x183   : > { %v1447_v33 = vpop.f32.mrf.mxu0 }
 0x184   : > { %v1476_v19 = vadd.f32 %v1447_v33, %v1358_v43  ;;  %v1596_v13 = vadd.f32 %v4055_v18, %v1478_v14  ;;  %v3144_v29 = vpop.f32.mrf.mxu1 }
 0x185   : > { %v3114_v34 = vpop.f32.mrf.mxu0 }
 0x186   : > { %v1481_v27 = vadd.f32 %v3114_v34, %v1363_v57  ;;  %v1594_v15 = vadd.f32 %v4057_v20, %v1476_v19  ;;  %v1822_v56 = vpop.f32.mrf.mxu1 }
 0x187   : > { %v1460_v38 = vpop.f32.mrf.mxu0 }
 0x188   : > { %v1479_v22 = vadd.f32 %v1460_v38, %v1361_v30  ;;  %v1599_v26 = vadd.f32 %v4059_v24, %v1481_v27 }
 0x189   : > { %v4070_v39 = vpop.f32.mrf.mxu0 }
 0x18a   : > { %v1482_v18 = vadd.f32 %v4070_v39, %v1364_v62 }
 0x18b   : > { %v4072_v61 = vpop.f32.mrf.mxu0 }
 0x18c   : > { %v1480_v20 = vadd.f32 %v4072_v61, %v1362_v32  ;;  %v1600_v39 = vadd.f32 %v4309_v17, %v1482_v18 }
 0x18d   : > { %v3130_v45 = vpop.f32.mrf.mxu0 }
 0x18e   : > { %v1721_v59 = vadd.f32 %v3130_v45, %v1595_v48  ;;  %v4310_v45 = vld [vmem:[#allocation13_spill] sm:$0xff] }
 0x18f   : > { %v1688_v52 = vpop.f32.mrf.mxu0 }
 0x190   : > { %v1719_v28 = vadd.f32 %v1688_v52, %v1593_v36  ;;  %v1839_v0 = vadd.f32 %v3140_v54, %v1721_v59  ;;  %v1597_v54 = vadd.f32 %v4308_v40, %v1479_v22  ;;  %v1598_v52 = vadd.f32 %v4310_v45, %v1480_v20  ;;  %v2112_v20 = vld [vmem:[#allocation3 + $0x30] sm:$0xf] }
 0x191   : > { %v3131_v2 = vpop.f32.mrf.mxu0 }
 0x192   : > { %v1722_v3 = vadd.f32 %v3131_v2, %v1596_v13  ;;  %v1837_v7 = vadd.f32 %v1806_v23, %v1719_v28  ;;  %v3145_v23 = vpop.f32.mrf.mxu1 }
 0x193   : > { %v1691_v1 = vpop.f32.mrf.mxu0 }
 0x194   : > { %v1720_v34 = vadd.f32 %v1691_v1, %v1594_v15  ;;  %v1840_v38 = vadd.f32 %v3141_v11, %v1722_v3  ;;  %v1825_v51 = vpop.f32.mrf.mxu1 }
 0x195   : > { %v3134_v53 = vpop.f32.mrf.mxu0 }
 0x196   : > { %v1725_v31 = vadd.f32 %v3134_v53, %v1599_v26  ;;  %v1838_v55 = vadd.f32 %v1809_v49, %v1720_v34 }
 0x197   : > { %v1704_v8 = vpop.f32.mrf.mxu0 }
 0x198   : > { %v1723_v58 = vadd.f32 %v1704_v8, %v1597_v54  ;;  %v1843_v2 = vadd.f32 %v3144_v29, %v1725_v31  ;;  %v2030_v54 = vld [vmem:[#allocation3] sm:$0xc] }
 0x199   : > { %v3135_v10 = vpop.f32.mrf.mxu0 }
 0x19a   : > { %v1726_v11 = vadd.f32 %v3135_v10, %v1600_v39  ;;  %v1841_v49 = vadd.f32 %v1822_v56, %v1723_v58 }
 0x19b   : > { %v1707_v21 = vpop.f32.mrf.mxu0 }
 0x19c   : > { %v1724_v1 = vadd.f32 %v1707_v21, %v1598_v52  ;;  %v1844_v8 = vadd.f32 %v3145_v23, %v1726_v11 }
 0x19d   : > { %v3150_v5 = vpop.f32.mrf.mxu0 }
 0x19e   : > { %v1957_v33 = vadd.f32 %v3150_v5, %v1839_v0  ;;  %v1842_v59 = vadd.f32 %v1825_v51, %v1724_v1 }
 0x19f   : > { %v1924_v24 = vpop.f32.mrf.mxu0 }
 0x1a0   : > { %1966 = vst.msk [vmem:[%s4093_s20 + $0x10] sm:$0xff] %vm1963_vm3, %v1957_v33  ;;  %v1974_v9 = vmax.f32 %v1957_v33, 0.0  ;;  %v1955_v25 = vadd.f32 %v1924_v24, %v1837_v7 }
 0x1a1   : > { %v3151_v41 = vpop.f32.mrf.mxu0 }
 0x1a2   : > { %v2998_v42 = vpack.c.bf16 %v1974_v9, %v1974_v9  ;;  %1964 = vst.msk [vmem:[%s4093_s20] sm:$0xff] %vm1963_vm3, %v1955_v25  ;;  %v1972_v44 = vmax.f32 %v1955_v25, 0.0  ;;  %v1958_v61 = vadd.f32 %v3151_v41, %v1840_v38 }
 0x1a3   : > { %v1927_v37 = vpop.f32.mrf.mxu0 }
 0x1a4   : > { %v2064_v46 = vshrl.u32 %v2998_v42, 16  ;;  %2101 = vst.msk [vmem:[#allocation3 + $0x28] sm:$0xf] %vm1984_vm0, %v2998_v42  ;;  %v3000_v60 = vpack.c.bf16 %v1972_v44, %v1972_v44  ;;  %v1975_v63 = vmax.f32 %v1958_v61, 0.0  ;;  %v1956_v12 = vadd.f32 %v1927_v37, %v1838_v55 }
 0x1a5   : > { %1967 = vst.msk [vmem:[%s4093_s20 + $0x18] sm:$0xff] %vm1963_vm3, %v1958_v61  ;;  %v3154_v47 = vpop.f32.mrf.mxu0  ;;  %v2067_v4 = vshll.u32 %v2998_v42, 16 }
 0x1a6   : > { %v2066_v53 = vrot.slane %v2064_v46, 7  ;;  %2096 = vst.msk [vmem:[#allocation3 + $0x20] sm:$0xf] %vm1984_vm0, %v3000_v60  ;;  %v2999_v48 = vpack.c.bf16 %v1975_v63, %v1975_v63  ;;  %v1961_v14 = vadd.f32 %v3154_v47, %v1843_v2  ;;  %v1973_v43 = vmax.f32 %v1956_v12, 0.0 }
 0x1a7   : > { %1965 = vst.msk [vmem:[%s4093_s20 + $0x8] sm:$0xff] %vm1963_vm3, %v1956_v12  ;;  %v1940_v57 = vpop.f32.mrf.mxu0 }
 0x1a8   : > { %v2069_v16 = vor.u32 %v2067_v4, %v2066_v53  ;;  %v2072_v36 = vshrl.u32 %v2999_v48, 16  ;;  %2102 = vst.msk [vmem:[#allocation3 + $0x2c] sm:$0xf] %vm1984_vm0, %v2999_v48  ;;  %v3001_v50 = vpack.c.bf16 %v1973_v43, %v1973_v43  ;;  %v1978_v19 = vmax.f32 %v1961_v14, 0.0 }
 0x1a9   : > { %1970 = vst.msk [vmem:[%s4093_s20 + $0x30] sm:$0xff] %vm1963_vm3, %v1961_v14  ;;  %v1959_v27 = vadd.f32 %v1940_v57, %v1841_v49  ;;  %v3155_v10 = vpop.f32.mrf.mxu0  ;;  %v2075_v29 = vshll.u32 %v2999_v48, 16  ;;  %v2070_v3 = vrot.slane %v2066_v53, 4  ;;  %v2940_v14 = vld [vmem:[%s4274_s3 + $0x10] sm:$0xf]  ;;  %v2152_v49 = vpop.permute.xlu1 %2151 }
 0x1aa   : > { %v2085_v13 = vsel %vm4110_vm5, %v2069_v16, %v2084_v35  ;;  %v2074_v28 = vrot.slane %v2072_v36, 7  ;;  %v1962_v30 = vadd.f32 %v3155_v10, %v1844_v8  ;;  %2097 = vst.msk [vmem:[#allocation3 + $0x24] sm:$0xf] %vm1984_vm0, %v3001_v50  ;;  %v2994_v21 = vpack.c.bf16 %v1978_v19, %v1978_v19  ;;  %v4318_v8 = vld [vmem:[#allocation10_spill] sm:$0xff] }
 0x1ab   : > { %2086 = vst [vmem:[#allocation3 + $0x18] sm:$0xf] %v2085_v13  ;;  %1968 = vst.msk [vmem:[%s4093_s20 + $0x20] sm:$0xff] %vm1963_vm3, %v1959_v27  ;;  %v1976_v62 = vmax.f32 %v1959_v27, 0.0  ;;  %v1943_v0 = vpop.f32.mrf.mxu0  ;;  %v2408_v43 = vsel %vm2172_vm1, %v2940_v14, 0  ;;  %v2160_v16 = vrot.slane %v2152_v49, %v4318_v8  ;;  %v2148_v36 = vrot.slane %v2140_v6, %v4318_v8 }
 0x1ac   : > { %v2077_v15 = vor.u32 %v2075_v29, %v2074_v28  ;;  %1971 = vst.msk [vmem:[%s4093_s20 + $0x38] sm:$0xff] %vm1963_vm3, %v1962_v30  ;;  %v1979_v22 = vmax.f32 %v1962_v30, 0.0  ;;  %v1960_v26 = vadd.f32 %v1943_v0, %v1842_v59  ;;  %v2009_v32 = vshrl.u32 %v2994_v21, 16  ;;  %v2931_v19 = vld [vmem:[%s4274_s3 + $0x4] sm:$0xf] }
 0x1ad   : > { %v2012_v5 = vshll.u32 %v2994_v21, 16  ;;  %v2049_v18 = vrot.slane %v2994_v21, 6  ;;  %2124 = vst.msk [vmem:[#allocation3 + $0x40] sm:$0xf] %vm1984_vm0, %v2994_v21  ;;  %v2996_v7 = vpack.c.bf16 %v1976_v62, %v1976_v62  ;;  %v4319_v59 = vmov 0.0  }
 0x1ae   : > { %v2078_v33 = vsel %vm3782_vm10, %v2070_v3, %v2077_v15  ;;  %v2995_v34 = vpack.c.bf16 %v1979_v22, %v1979_v22  ;;  %1969 = vst.msk [vmem:[%s4093_s20 + $0x28] sm:$0xff] %vm1963_vm3, %v1960_v26  ;;  %v1977_v31 = vmax.f32 %v1960_v26, 0.0  ;;  %v2011_v24 = vrot.slane %v2009_v32, 5  ;;  %v2946_v13 = vld [vmem:[%s4274_s3 + $0x18] sm:$0xf]  ;;  %s3362_s20 = smov [#allocation4]  }
 0x1af   : > { %2087 = vst.msk [vmem:[#allocation3 + $0x1c] sm:$0xf] %vm1984_vm0, %v2078_v33  ;;  %v2014_v38 = vrot.slane %v2012_v5, 6  ;;  %v2050_v9 = vrot.slane %v2049_v18, 4  ;;  %v2103_v25 = vrot.slane %v2009_v32, 7  ;;  %v2039_v41 = vrot.slane %v2996_v7, 6 }
 0x1b0   : > { %2056 = vst.msk [vmem:[#allocation3 + $0x10] sm:$0xc] %vm2028_vm4, %v2049_v18  ;;  %v2018_v17 = vshrl.u32 %v2995_v34, 16  ;;  %v2021_v39 = vshll.u32 %v2995_v34, 16  ;;  %v2051_v23 = vrot.slane %v2995_v34, 6  ;;  %v2997_v61 = vpack.c.bf16 %v1977_v31, %v1977_v31  ;;  %v3294_v40 = vld [vmem:[#allocation3 + $0x28] sm:$0xff]  }
 0x1b1   : > { %2119 = vst.msk [vmem:[#allocation3 + $0x38] sm:$0xf] %vm1984_vm0, %v2996_v7  ;;  %2125 = vst.msk [vmem:[#allocation3 + $0x44] sm:$0xf] %vm1984_vm0, %v2995_v34  ;;  %v2015_v42 = vor.u32 %v2014_v38, %v2011_v24  ;;  %v2104_v44 = vor.u32 %v2103_v25, %v2012_v5  ;;  %v2040_v60 = vrot.slane %v2039_v41, 4  ;;  %v2105_v12 = vrot.slane %v2103_v25, 4 }
 0x1b2   : > { %2047 = vst.msk [vmem:[#allocation3 + $0x8] sm:$0xc] %vm2028_vm4, %v2039_v41  ;;  %v2020_v45 = vrot.slane %v2018_v17, 5  ;;  %v2023_v52 = vrot.slane %v2021_v39, 6  ;;  %v2052_v58 = vsel %vm3688_vm7, %v2050_v9, %v2051_v23  ;;  %v2106_v11 = vrot.slane %v2018_v17, 7  ;;  %v3291_v30 = vld [vmem:[#allocation3 + $0x20] sm:$0xff]  }
 0x1b3   : > { %v2113_v2 = vsel %vm4110_vm5, %v2104_v44, %v2112_v20  ;;  %v2031_v37 = vsel %vm4136_vm6, %v2015_v42, %v2030_v54  ;;  %2057 = vst.msk [vmem:[#allocation3 + $0x14] sm:$0xf] %vm1984_vm0, %v2052_v58  ;;  %2120 = vst.msk [vmem:[#allocation3 + $0x3c] sm:$0xf] %vm1984_vm0, %v2997_v61  ;;  %v2016_v46 = vrot.slane %v2015_v42, 4  ;;  %v2041_v1 = vrot.slane %v2997_v61, 6 }
 0x1b4   : > { %2114 = vst [vmem:[#allocation3 + $0x30] sm:$0xf] %v2113_v2  ;;  %2032 = vst [vmem:[#allocation3] sm:$0xc] %v2031_v37  ;;  %v2024_v63 = vor.u32 %v2023_v52, %v2020_v45  ;;  %v2107_v47 = vor.u32 %v2106_v11, %v2021_v39  ;;  %v2232_v29 = vsel %vm2172_vm1, %v2931_v19, 0  ;;  %v2526_v21 = vsel %vm2172_vm1, %v2946_v13, 0 }
 0x1b5   : > { %v2042_v4 = vsel %vm3688_vm7, %v2040_v60, %v2041_v1  ;;  %v2937_v3 = vld [vmem:[%s4274_s3 + $0xc] sm:$0xf]  ;;  %v2952_v26 = vld [vmem:[%s4274_s3 + $0x20] sm:$0xf]  ;;  %v2335_v33 = vld [vmem:[#allocation3 + $0x18] sm:$0xf] }
 0x1b6   : > { %v2025_v53 = vsel %vm3835_vm15, %v2016_v46, %v2024_v63  ;;  %v2108_v48 = vsel %vm3782_vm10, %v2105_v12, %v2107_v47  ;;  %2048 = vst.msk [vmem:[#allocation3 + $0xc] sm:$0xf] %vm1984_vm0, %v2042_v4  ;;  %v2350_v5 = vsel %vm2172_vm1, %v2937_v3, 0  ;;  %v2336_v7 = vld [vmem:[#allocation3 + $0x1c] sm:$0xf]  ;;  %v2642_v56 = vsel %vm2172_vm1, %v2952_v26, 0 }
 0x1b7   : > { %2033 = vst.msk [vmem:[#allocation3 + $0x4] sm:$0xf] %vm1984_vm0, %v2025_v53  ;;  %2115 = vst.msk [vmem:[#allocation3 + $0x34] sm:$0xf] %vm1984_vm0, %v2108_v48  ;;  %v2338_v20 = vmul.bf16 %v2336_v7, %v2160_v16  ;;  %v2943_v34 = vld [vmem:[%s4274_s3 + $0x14] sm:$0xf]  ;;  %v2337_v31 = vmul.bf16 %v2335_v33, %v2148_v36 }
 0x1b8   : > { %v2466_v38 = vsel %vm2172_vm1, %v2943_v34, 0  ;;  %v3293_v9 = vld [vmem:[#allocation3 + $0x40] sm:$0xff]   ;;  %v2949_v25 = vld [vmem:[%s4274_s3 + $0x1c] sm:$0xf]  ;;  %s3300_s13 = sshll.u32 %s3362_s20, 4  ;;  %s3301_s13 = int_to_ptr.vmem [resolvable:$false] %s3300_s13 }
 0x1b9   : > { %v2938_v24 = vcombine.low %v2337_v31, %v2338_v20  ;;  %v2584_v54 = vsel %vm2172_vm1, %v2949_v25, 0  ;;  %v2928_v60 = vld [vmem:[%s4275_s4] ss:$0 sm:$0xff]  ;;  %s3302_s21 = scalar_lea.vmem %s3301_s13, 512  ;;  %p3303_p0 = scmp.lt.s32.totalorder %s4228_s26, %s3301_s13 }
 0x1ba   : > { %v3290_v35 = vld [vmem:[#allocation3 + $0x10] sm:$0xff]   ;;  %v3295_v41 = vld [vmem:[#allocation3 + $0x38] sm:$0xff]   ;;  %p3304_p1 = scmp.lt.s32.totalorder %s3302_s21, %s3296_s9 }
 0x1bb   : > { %3171 = vmatmul.mubr.msk.bf16.vlgmr.msra.gmra.mxu0 %vm1963_vm3, %v3290_v35  ;;  %v2135_v57 = vld [vmem:[#allocation3] sm:$0xf]  ;;  %v2511_v0 = vld [vmem:[#allocation3 + $0x30] sm:$0xf] }
 0x1bc   : > { %3181 = vmatpush3.bf16.msra.mxu0 %v2408_v43  ;;  %3182 = vmatprep.mubr.msk.bf16.mxu0 %vm3361_vm2, %v4319_v59  ;;  %v2161_v27 = vmul.bf16 %v2148_v36, %v2135_v57  ;;  %v2513_v22 = vmul.bf16 %v2511_v0, %v2148_v36  ;;  %p3305_p2 = por %p3304_p1, %p3303_p0 }
 0x1bd   : > { %3192 = vmatprep.subr.bf16.mxu0 %v4319_v59  ;;  %v3292_v32 = vld [vmem:[#allocation3 + $0x8] sm:$0xff]  }
 0x1be   : > { %v2136_v50 = vld [vmem:[#allocation3 + $0x4] sm:$0xf]  ;;  %v2512_v62 = vld [vmem:[#allocation3 + $0x34] sm:$0xf]  ;;  %p3306_p3 = pnand %p3305_p2, %p3299_p13 }
 0x1bf   : > { %v2162_v10 = vmul.bf16 %v2160_v16, %v2136_v50  ;;  %v2514_v15 = vmul.bf16 %v2512_v62, %v2160_v16 }
 0x1c1   : > { %v2929_v28 = vcombine.low %v2161_v27, %v2162_v10  ;;  %v2947_v18 = vcombine.low %v2513_v22, %v2514_v15 }
 0x1c3   : > { %3159 = vmatmul.mubr.msk.bf16.vlgmr.msra.gmra.mxu1 %vm1963_vm3, %v2929_v28  ;;  %3183 = vmatmul.mubr.msk.bf16.vlgmr.msra.gmra.mxu0 %vm1963_vm3, %v3291_v30 }
 0x1c4   : > { %3163 = vmatpush3.bf16.msra.mxu1 %v2232_v29  ;;  %3164 = vmatprep.mubr.msk.bf16.mxu1 %vm3361_vm2, %v4319_v59 }
 0x1c5   : > { %3174 = vmatprep.subr.bf16.mxu1 %v4319_v59  ;;  %3193 = vmatpush3.bf16.msra.mxu0 %v2526_v21 }
 0x1c6   : > { %3194 = vmatprep.mubr.msk.bf16.mxu0 %vm3361_vm2, %v4319_v59  ;;  %3204 = vmatprep.subr.bf16.mxu0 %v4319_v59 }
 0x1cb   : > { %3165 = vmatmul.mubr.msk.bf16.vlgmr.msra.gmra.mxu1 %vm1963_vm3, %v3292_v32  ;;  %3195 = vmatmul.mubr.msk.bf16.vlgmr.msra.gmra.mxu0 %vm1963_vm3, %v2947_v18 }
 0x1cc   : > { %3175 = vmatpush3.bf16.msra.mxu1 %v2350_v5  ;;  %3176 = vmatprep.mubr.msk.bf16.mxu1 %vm3361_vm2, %v4319_v59 }
 0x1cd   : > { %3186 = vmatprep.subr.bf16.mxu1 %v4319_v59  ;;  %3205 = vmatpush3.bf16.msra.mxu0 %v2642_v56 }
 0x1ce   : > { %3206 = vmatprep.mubr.msk.bf16.mxu0 %vm3361_vm2, %v4319_v59 }
 0x1d3   : > { %3177 = vmatmul.mubr.msk.bf16.vlgmr.msra.gmra.mxu1 %vm1963_vm3, %v2938_v24  ;;  %3207 = vmatmul.mubr.msk.bf16.vlgmr.msra.gmra.mxu0 %vm1963_vm3, %v3293_v9 }
 0x1d4   : > { %3187 = vmatpush3.bf16.msra.mxu1 %v2466_v38  ;;  %3188 = vmatprep.mubr.msk.bf16.mxu1 %vm3361_vm2, %v4319_v59 }
 0x1d5   : > { %3198 = vmatprep.subr.bf16.mxu1 %v4319_v59 }
 0x1db   : > { %3189 = vmatmul.mubr.msk.bf16.vlgmr.msra.gmra.mxu1 %vm1963_vm3, %v3294_v40 }
 0x1dc   : > { %3199 = vmatpush3.bf16.msra.mxu1 %v2584_v54  ;;  %3200 = vmatprep.mubr.msk.bf16.mxu1 %vm3361_vm2, %v4319_v59 }
 0x1e3   : > { %3201 = vmatmul.mubr.msk.bf16.vlgmr.msra.gmra.mxu1 %vm1963_vm3, %v3295_v41 }
 0x27b   : > { %v2326_v17 = vpop.f32.mrf.mxu0 }
 0x27d   : > { %v3172_v39 = vpop.f32.mrf.mxu0 }
 0x27f   : > { %v2329_v23 = vpop.f32.mrf.mxu0 }
 0x281   : > { %v3173_v42 = vpop.f32.mrf.mxu0 }
 0x283   : > { %v2210_v44 = vpop.f32.mrf.mxu1  ;;  %v2444_v61 = vpop.f32.mrf.mxu0 }
 0x284   : > { %v2217_v47 = vadd.f32 %v2928_v60, %v2210_v44 }
 0x285   : > { %v3160_v45 = vpop.f32.mrf.mxu1  ;;  %v3184_v52 = vpop.f32.mrf.mxu0 }
 0x287   : > { %v2213_v55 = vpop.f32.mrf.mxu1  ;;  %v2447_v58 = vpop.f32.mrf.mxu0 }
 0x288   : > { %v2218_v49 = vadd.f32 %v2928_v60, %v2213_v55 }
 0x289   : > { %v3161_v2 = vpop.f32.mrf.mxu1  ;;  %v3185_v37 = vpop.f32.mrf.mxu0 }
 0x28b   : > { %v2268_v11 = vpop.f32.mrf.mxu1  ;;  %v2562_v46 = vpop.f32.mrf.mxu0 }
 0x28c   : > { %v2275_v4 = vadd.f32 %v2268_v11, %v2217_v47 }
 0x28d   : > { %v3166_v63 = vpop.f32.mrf.mxu1  ;;  %v3196_v1 = vpop.f32.mrf.mxu0 }
 0x28e   : > { %v2333_v57 = vadd.f32 %v2326_v17, %v2275_v4 }
 0x28f   : > { %v2271_v12 = vpop.f32.mrf.mxu1  ;;  %v2565_v51 = vpop.f32.mrf.mxu0 }
 0x290   : > { %v2276_v43 = vadd.f32 %v2271_v12, %v2218_v49 }
 0x291   : > { %v3167_v53 = vpop.f32.mrf.mxu1  ;;  %v3197_v48 = vpop.f32.mrf.mxu0 }
 0x292   : > { %v2334_v19 = vadd.f32 %v2329_v23, %v2276_v43 }
 0x293   : > { %v2386_v14 = vpop.f32.mrf.mxu1  ;;  %v2678_v6 = vpop.f32.mrf.mxu0 }
 0x294   : > { %v2393_v36 = vadd.f32 %v2386_v14, %v2333_v57 }
 0x295   : > { %v3178_v35 = vpop.f32.mrf.mxu1  ;;  %v3208_v8 = vpop.f32.mrf.mxu0 }
 0x296   : > { %v2451_v28 = vadd.f32 %v2444_v61, %v2393_v36 }
 0x297   : > { %v2389_v16 = vpop.f32.mrf.mxu1  ;;  %v2681_v59 = vpop.f32.mrf.mxu0 }
 0x298   : > { %v2394_v13 = vadd.f32 %v2389_v16, %v2334_v19 }
 0x299   : > { %v3179_v50 = vpop.f32.mrf.mxu1  ;;  %v3209_v27 = vpop.f32.mrf.mxu0 }
 0x29a   : > { %v2452_v62 = vadd.f32 %v2447_v58, %v2394_v13 }
 0x29b   : > { %v2502_v10 = vpop.f32.mrf.mxu1 }
 0x29c   : > { %v2509_v30 = vadd.f32 %v2502_v10, %v2451_v28 }
 0x29d   : > { %v3190_v29 = vpop.f32.mrf.mxu1 }
 0x29e   : > { %v2569_v15 = vadd.f32 %v2562_v46, %v2509_v30 }
 0x29f   : > { %v2505_v21 = vpop.f32.mrf.mxu1 }
 0x2a0   : > { %v2510_v3 = vadd.f32 %v2505_v21, %v2452_v62 }
 0x2a1   : > { %v3191_v0 = vpop.f32.mrf.mxu1 }
 0x2a2   : > { %v2570_v18 = vadd.f32 %v2565_v51, %v2510_v3 }
 0x2a3   : > { %v2620_v22 = vpop.f32.mrf.mxu1 }
 0x2a4   : > { %v2627_v26 = vadd.f32 %v2620_v22, %v2569_v15 }
 0x2a5   : > { %v3202_v32 = vpop.f32.mrf.mxu1 }
 0x2a6   : > { %v2685_v5 = vadd.f32 %v2678_v6, %v2627_v26 }
 0x2a7   : > { %v2623_v7 = vpop.f32.mrf.mxu1 }
 0x2a8   : > { %2687 = vst.msk [vmem:[%s306_s25] sm:$0xff] %vm1963_vm3, %v2685_v5  ;;  %v2628_v56 = vadd.f32 %v2623_v7, %v2570_v18 }
 0x2a9   : > { %v3203_v33 = vpop.f32.mrf.mxu1 }
 0x2aa   : > { %v2686_v20 = vadd.f32 %v2681_v59, %v2628_v56 }
 0x2ac   : > { %2688 = vst.msk [vmem:[%s306_s25 + $0x8] sm:$0xff] %vm1963_vm3, %v2686_v20 }
 0x2ad   : > { %3309 = shalt.err (!%p3306_p3)
}
 0x2ae   : > { %s3310_s22 = scalar_lea.hbm %s4226_s18, 256  ;;  %s3314_s25 = scalar_lea.hbm %s4279_s8, 512 }
 0x2af   : > { %p3311_p4 = scmp.ne.s32.totalorder %s4226_s18, %s3310_s22  ;;  %p3315_p9 = scmp.lt.s32.totalorder %s4226_s18, %s4279_s8 }
 0x2b0   : > { %p3316_p10 = scmp.lt.s32.totalorder %s3314_s25, %s3310_s22 }
 0x2b1   : > { %p3312_p7 = pnand %p3311_p4, %p3448_p5 }
 0x2b2   : > { %p3317_p11 = por %p3316_p10, %p3315_p9 }
 0x2b3   : > { %p3313_p8 = pneg %p3312_p7 }
 0x2b5   : > { %p3318_p12 = pnand %p3317_p11, %p3313_p8 }
 0x2b7   : > { %3321 = shalt.err (!%p3318_p12)
}
 0x2b8   : > { %s3363_s17 = smov 128   ;;  %s3364_s9 = smov 8  }
 0x2b9   : > { %3219 = dma.vmem_to_hbm [thread:$0]  (%p3448_p5), %s4228_s26, 256, %s4226_s18, %s4231_s19, %s3363_s17, %s3363_s17, %s3364_s9  }
 0x2ba PF: > { %p3225_p13 = scmp.ge.s32.totalorder %s3356_s30, 2  ;;  %s2734_s20 = sand.u32 1, %s3344_s27  }
 0x2bb   : > { %s2735_s13 = scalar_lea.sflag [#allocation5], %s2734_s20 }
 0x2bc   : > { %p3222_p0 = pnand %p3225_p13, %p3452_p6 }
 0x2be   : > { %p3223_p1 = pneg %p3222_p0 }
 0x2c0   : > { %3339 = dma.done.wait (%p3223_p1), %s2735_s13, 256  }
 0x2c1   : > { %3341 = vsyncadd (%p3223_p1), %s2735_s13, 4294967040  ;;  %p19_p2 = scmp.ge.s32.totalorder %s3435_s11, 4   ;;  %s4320_s27 = smov %s3348_s28 }
 0x2c2   : > { %s4321_s28 = smov %s3352_s29  ;;  %s4322_s29 = smov %s3446_s14 }
 0x2c3   : > { %s4323_s30 = smov %s3435_s11  ;;  %21 = sbr.rel (!%p19_p2) target bundleno = 3 (0x3), region = 127 }
 0x2c8   :  { %2740 = vsyncpa [#allocation5], 1 }
 0x2c9   :  { %2742 = vsyncpa [#allocation5 + $0x1], 1 }

</bundles_post_ra>
